<compile_context>
chip_gen: v7x
topology: tpu7x:2x2x1
jax: 0.10.0
libtpu: 0.0.40
codegen_flags: <defaults>
</compile_context>

<pallas_src>
import math

import jax
import jax.numpy as jnp
from jax.experimental import pallas as pl
from jax.experimental.pallas import tpu as pltpu

# Small, module-consistent shapes (original: L=100, embed=64, vocab=len(voca)).
L = 8            # sequence length
E = 32           # embed_size / embed_dim
VOCAB = 50       # vocabulary size
H1 = 50          # hidden width of the classifier head
NCLS = 2         # output classes
EPS = 1e-5       # nn.LayerNorm default eps
NEG_INF = -1e9   # additive attention-mask value
OUT_PAD = 128    # lane-dense output width (classes live in lanes 0..NCLS-1)
B_TILE = 8       # examples per grid program

# Packing invariants for the (8, 3E) parameter slab.
assert H1 <= 3 * E and NCLS <= 3 * E and 5 + NCLS <= 8


# ---------------------------------------------------------------------------
# Fused kernel (per B_TILE examples):
#   +pos -> LayerNorm -> composed QKV -> 1-head attention (masked) ->
#   flatten head with folded out_proj -> ReLU -> VPU logits -> Softmax
# ---------------------------------------------------------------------------
def fused_kernel(xe_ref, vl_ref, pos_ref, vecs_ref, wqkv_ref, w1_ref, out_ref):
    vecs = vecs_ref[...]                              # (8, 3E) packed row params
    gamma = vecs[0:1, 0:E]                            # LayerNorm weight
    beta  = vecs[1:2, 0:E]                            # LayerNorm bias
    bqkv  = vecs[2:3, :]                              # (1, 3E) composed QKV bias
    b1    = vecs[3:4, 0:H1]                           # folded head bias 1
    b2_0  = vecs[4:5, 0:1]                            # head bias 2, class 0
    b2_1  = vecs[4:5, 1:2]                            # head bias 2, class 1
    w2t0  = vecs[5:6, 0:H1]                           # W2^T row 0
    w2t1  = vecs[6:7, 0:H1]                           # W2^T row 1

    # Positional encoding + LayerNorm over the embedding dim (B_TILE*L rows).
    pe = xe_ref[...] + pos_ref[...]                   # (B_TILE*L, E)
    mu = jnp.mean(pe, axis=-1, keepdims=True)
    var = jnp.mean((pe - mu) ** 2, axis=-1, keepdims=True)
    z = (pe - mu) * jax.lax.rsqrt(var + EPS) * gamma + beta

    # Composed (Wq/Wk/Wv ∘ MHA in_proj) in one MXU pass at M = B_TILE*L;
    # the 1/sqrt(E) attention scale is already folded into the Q columns.
    qkv = jnp.dot(z, wqkv_ref[...], preferred_element_type=jnp.float32) + bqkv
    qp = qkv[:, 0:E].reshape(B_TILE, L, E)
    kp = qkv[:, E:2 * E].reshape(B_TILE, L, E)
    vp = qkv[:, 2 * E:3 * E].reshape(B_TILE, L, E)

    # Per-example attention scores; additive key mask built in-kernel from the
    # per-example valid lengths (no (L, L) mask DMA).
    scores = jnp.einsum('ble,bke->blk', qp, kp,
                        preferred_element_type=jnp.float32)        # (B, L, L)
    key_pos = jax.lax.broadcasted_iota(jnp.int32, (B_TILE, L, L), 2)
    scores = scores + jnp.where(key_pos < vl_ref[...], 0.0, NEG_INF)

    # Numerically stable softmax over keys; reciprocal goes to the EUP.
    m = jnp.max(scores, axis=-1, keepdims=True)
    p = jnp.exp(scores - m)
    attn = p * pl.reciprocal(jnp.sum(p, axis=-1, keepdims=True), approx=True)

    ctx = jnp.einsum('blk,bke->ble', attn, vp,
                     preferred_element_type=jnp.float32)           # (B, L, E)

    # Classifier head on torch.flatten(y); out_proj already folded into w1 on
    # the host.  L independent matmuls at M = B_TILE, combined with a pairwise
    # tree sum (no serial accumulator dependency chain).
    partials = [
        jnp.dot(ctx[:, l, :], w1_ref[l * E:(l + 1) * E, :],
                preferred_element_type=jnp.float32)
        for l in range(L)
    ]
    while len(partials) > 1:
        nxt = [partials[i] + partials[i + 1] for i in range(0, len(partials) - 1, 2)]
        if len(partials) % 2:
            nxt.append(partials[-1])
        partials = nxt
    h = jnp.maximum(partials[0] + b1, 0.0)            # (B_TILE, H1); Dropout = id

    # 2-class logits on the VPU (multiply + lane reduce); MXU slot stays free.
    l0 = jnp.sum(h * w2t0, axis=-1, keepdims=True) + b2_0          # (B_TILE, 1)
    l1 = jnp.sum(h * w2t1, axis=-1, keepdims=True) + b2_1

    # Lane-dense (B_TILE, 128) softmax block: real classes in lanes 0..1,
    # -1e9 padding elsewhere (exp underflows to 0, so probs are exact).
    lane = jax.lax.broadcasted_iota(jnp.int32, (B_TILE, OUT_PAD), 1)
    logits = jnp.where(lane == 0, l0, jnp.where(lane == 1, l1, NEG_INF))
    m2 = jnp.max(logits, axis=-1, keepdims=True)
    e = jnp.exp(logits - m2)
    out_ref[...] = e * pl.reciprocal(jnp.sum(e, axis=-1, keepdims=True))


# ---------------------------------------------------------------------------
# Wrapper
# ---------------------------------------------------------------------------
def fused_forward(xe2, vl, packed):
    B = vl.shape[0]
    assert B % B_TILE == 0
    return pl.pallas_call(
        fused_kernel,
        out_shape=jax.ShapeDtypeStruct((B, OUT_PAD), jnp.float32),
        grid=(B // B_TILE,),
        in_specs=[
            pl.BlockSpec((B_TILE * L, E), lambda b: (b, 0)),      # activations
            pl.BlockSpec((B_TILE, 1, 1), lambda b: (b, 0, 0)),    # valid lengths
            pl.BlockSpec((B_TILE * L, E), lambda b: (0, 0)),      # pos (resident)
            pl.BlockSpec((8, 3 * E), lambda b: (0, 0)),           # row params
            pl.BlockSpec((E, 3 * E), lambda b: (0, 0)),           # composed QKV
            pl.BlockSpec((L * E, H1), lambda b: (0, 0)),          # folded W1
        ],
        out_specs=pl.BlockSpec((B_TILE, OUT_PAD), lambda b: (b, 0)),
        compiler_params=pltpu.CompilerParams(
            dimension_semantics=("parallel",)),
    )(xe2, vl, packed["pos_tiled"], packed["vecs"], packed["wqkv"], packed["w1"])


def sinusoidal_pos_encoding(length, dim):
    pos = jnp.arange(length, dtype=jnp.float32)[:, None]
    idx = jnp.arange(0, dim, 2, dtype=jnp.float32)
    div = jnp.exp(-math.log(10000.0) * idx / dim)
    pe = jnp.zeros((length, dim), jnp.float32)
    pe = pe.at[:, 0::2].set(jnp.sin(pos * div))
    pe = pe.at[:, 1::2].set(jnp.cos(pos * div))
    return pe


def init_params(key):
    ks = jax.random.split(key, 10)

    def lin(k, fan_in, fan_out):
        # Stored transposed, so the kernel computes x @ W + b (PyTorch-style init).
        kw, kb = jax.random.split(k)
        bound = 1.0 / math.sqrt(fan_in)
        w = jax.random.uniform(kw, (fan_in, fan_out), jnp.float32, -bound, bound)
        b = jax.random.uniform(kb, (1, fan_out), jnp.float32, -bound, bound)
        return w, b

    p = {}
    p["embed"] = jax.random.normal(ks[0], (VOCAB, E), jnp.float32) * 0.1
    p["ln_gamma"] = jnp.ones((1, E), jnp.float32)
    p["ln_beta"] = jnp.zeros((1, E), jnp.float32)
    p["wq"], p["bq"] = lin(ks[1], E, E)
    p["wk"], p["bk"] = lin(ks[2], E, E)
    p["wv"], p["bv"] = lin(ks[3], E, E)
    # MultiheadAttention in_proj (q/k/v) and out_proj.
    p["wiq"], p["biq"] = lin(ks[4], E, E)
    p["wik"], p["bik"] = lin(ks[5], E, E)
    p["wiv"], p["biv"] = lin(ks[6], E, E)
    p["wo"], p["bo"] = lin(ks[7], E, E)
    # Classifier head.
    p["w1"], p["b1"] = lin(ks[8], L * E, H1)
    p["w2"], p["b2"] = lin(ks[9], H1, NCLS)
    return p


def pack_params(p):
    """Host-side algebra (done once): compose the stacked linear pairs, fold the
    1/sqrt(E) scale into Q, concatenate QKV, fold out_proj into the flatten head,
    and pack every small row parameter into one (8, 3E) slab."""
    scale = 1.0 / math.sqrt(E)
    wq_c = (p["wq"] @ p["wiq"]) * scale
    bq_c = (p["bq"] @ p["wiq"] + p["biq"]) * scale
    wk_c = p["wk"] @ p["wik"]
    bk_c = p["bk"] @ p["wik"] + p["bik"]
    wv_c = p["wv"] @ p["wiv"]
    bv_c = p["bv"] @ p["wiv"] + p["biv"]
    wqkv = jnp.concatenate([wq_c, wk_c, wv_c], axis=1)        # (E, 3E)
    bqkv = jnp.concatenate([bq_c, bk_c, bv_c], axis=1)        # (1, 3E)

    # Fold MHA out_proj into the flatten -> Linear(50) head:
    #   W1'_l = Wo @ W1_l,  b1' = b1 + bo @ sum_l W1_l.
    w1r = p["w1"].reshape(L, E, H1)
    w1f = jnp.einsum('ef,lfh->leh', p["wo"], w1r).reshape(L * E, H1)
    b1f = p["b1"] + p["bo"] @ jnp.sum(w1r, axis=0)

    vecs = jnp.zeros((8, 3 * E), jnp.float32)
    vecs = vecs.at[0, :E].set(p["ln_gamma"][0])
    vecs = vecs.at[1, :E].set(p["ln_beta"][0])
    vecs = vecs.at[2, :].set(bqkv[0])
    vecs = vecs.at[3, :H1].set(b1f[0])
    vecs = vecs.at[4, :NCLS].set(p["b2"][0])
    vecs = vecs.at[5:5 + NCLS, :H1].set(p["w2"].T)            # (NCLS, H1)

    pos = sinusoidal_pos_encoding(L, E)
    return {
        "embed": p["embed"],
        "pos_tiled": jnp.tile(pos, (B_TILE, 1)),              # (B_TILE*L, E)
        "vecs": vecs,
        "wqkv": wqkv,
        "w1": w1f,
    }


@jax.jit
def forward(x_tokens, valid_len, packed):
    # TODO(synk): nn.Embedding token gather stays as a single batched plain-JAX
    # gather outside the kernel; the +pos add and everything downstream is fused.
    B = x_tokens.shape[0]
    xe = packed["embed"][x_tokens].reshape(B * L, E)          # (B*L, E)
    vl = valid_len.reshape(B, 1, 1).astype(jnp.int32)
    probs = fused_forward(xe, vl, packed)                     # (B, 128) lane-dense
    return probs[:, :NCLS]                                    # (B, 2) softmax rows


def reference_forward(x_tokens, valid_len, p):
    """Pure-JAX reference with the original (un-composed) parameterisation."""
    pos = sinusoidal_pos_encoding(L, E)
    xe = p["embed"][x_tokens]                                 # (B, L, E)
    pe = xe + pos
    mu = pe.mean(-1, keepdims=True)
    var = ((pe - mu) ** 2).mean(-1, keepdims=True)
    z = (pe - mu) / jnp.sqrt(var + EPS) * p["ln_gamma"][0] + p["ln_beta"][0]
    q = (z @ p["wq"] + p["bq"]) @ p["wiq"] + p["biq"]
    k = (z @ p["wk"] + p["bk"]) @ p["wik"] + p["bik"]
    v = (z @ p["wv"] + p["bv"]) @ p["wiv"] + p["biv"]
    scores = jnp.einsum('ble,bke->blk', q, k) / math.sqrt(E)
    key_pos = jnp.arange(L)[None, None, :]
    scores = scores + jnp.where(key_pos < valid_len.reshape(-1, 1, 1), 0.0, NEG_INF)
    attn = jax.nn.softmax(scores, axis=-1)
    ctx = jnp.einsum('blk,bke->ble', attn, v)
    y = ctx @ p["wo"] + p["bo"]
    h = jnp.maximum(y.reshape(y.shape[0], L * E) @ p["w1"] + p["b1"], 0.0)
    logits = h @ p["w2"] + p["b2"]
    return jax.nn.softmax(logits, axis=-1)


if __name__ == "__main__":
    key = jax.random.PRNGKey(0)
    pkey, tkey, vkey = jax.random.split(key, 3)
    params = init_params(pkey)
    packed = pack_params(params)                              # host-side algebra, once

    B = 32                                                    # batch, grid = (B // B_TILE,)
    x_tokens = jax.random.randint(tkey, (B, L), 0, VOCAB)
    valid_len = jax.random.randint(vkey, (B,), 1, L + 1).astype(jnp.int32)

    out = forward(x_tokens, valid_len, packed)
    out = jax.block_until_ready(out)

    assert out.shape == (B, NCLS)
    assert bool(jnp.isfinite(out).all())
    assert float(jnp.abs(out.sum(-1) - 1.0).max()) < 1e-3     # softmax rows sum to 1

    ref = reference_forward(x_tokens, valid_len, params)
    assert float(jnp.abs(out - ref).max()) < 2e-2             # approx-recip tolerance

    print("KERNEL_OK")
</pallas_src>

<mosaic_0001>
module attributes {stable_mosaic.version = 11 : i64} {
  func.func @fused_kernel(%arg0: i32, %arg1: memref<64x32xf32, #tpu.memory_space<vmem>>, %arg2: memref<8x1x1xi32, #tpu.memory_space<vmem>>, %arg3: memref<64x32xf32, #tpu.memory_space<vmem>>, %arg4: memref<8x96xf32, #tpu.memory_space<vmem>>, %arg5: memref<32x96xf32, #tpu.memory_space<vmem>>, %arg6: memref<256x50xf32, #tpu.memory_space<vmem>>, %arg7: memref<8x128xf32, #tpu.memory_space<vmem>>) attributes {dimension_semantics = [#tpu.dimension_semantics<parallel>], iteration_bounds = array<i64: 4>, scalar_prefetch = 0 : i64, scratch_operands = 0 : i64, tpu.core_type = #tpu.core_type<tc>, window_params = [{transform_indices = @transform_0, window_bounds = array<i64: 64, 32>}, {transform_indices = @transform_1, window_bounds = array<i64: 8, 1, 1>}, {pipeline_mode = #tpu.pipeline_mode<synchronous>, transform_indices = @transform_2, window_bounds = array<i64: 64, 32>}, {pipeline_mode = #tpu.pipeline_mode<synchronous>, transform_indices = @transform_3, window_bounds = array<i64: 8, 96>}, {pipeline_mode = #tpu.pipeline_mode<synchronous>, transform_indices = @transform_4, window_bounds = array<i64: 32, 96>}, {pipeline_mode = #tpu.pipeline_mode<synchronous>, transform_indices = @transform_5, window_bounds = array<i64: 256, 50>}, {transform_indices = @transform_6, window_bounds = array<i64: 8, 128>}]} {
    %c0 = arith.constant 0 : index
    %c0_0 = arith.constant 0 : index
    %0 = vector.load %arg4[%c0, %c0_0] : memref<8x96xf32, #tpu.memory_space<vmem>>, vector<8x96xf32>
    %1 = vector.extract_strided_slice %0 {offsets = [0, 0], sizes = [1, 32], strides = [1, 1]} : vector<8x96xf32> to vector<1x32xf32>
    %2 = vector.extract_strided_slice %0 {offsets = [1, 0], sizes = [1, 32], strides = [1, 1]} : vector<8x96xf32> to vector<1x32xf32>
    %3 = vector.extract_strided_slice %0 {offsets = [2, 0], sizes = [1, 96], strides = [1, 1]} : vector<8x96xf32> to vector<1x96xf32>
    %4 = vector.extract_strided_slice %0 {offsets = [3, 0], sizes = [1, 50], strides = [1, 1]} : vector<8x96xf32> to vector<1x50xf32>
    %5 = vector.extract_strided_slice %0 {offsets = [4, 0], sizes = [1, 1], strides = [1, 1]} : vector<8x96xf32> to vector<1x1xf32>
    %6 = vector.extract_strided_slice %0 {offsets = [4, 1], sizes = [1, 1], strides = [1, 1]} : vector<8x96xf32> to vector<1x1xf32>
    %7 = vector.extract_strided_slice %0 {offsets = [5, 0], sizes = [1, 50], strides = [1, 1]} : vector<8x96xf32> to vector<1x50xf32>
    %8 = vector.extract_strided_slice %0 {offsets = [6, 0], sizes = [1, 50], strides = [1, 1]} : vector<8x96xf32> to vector<1x50xf32>
    %c0_1 = arith.constant 0 : index
    %c0_2 = arith.constant 0 : index
    %9 = vector.load %arg1[%c0_1, %c0_2] : memref<64x32xf32, #tpu.memory_space<vmem>>, vector<64x32xf32>
    %c0_3 = arith.constant 0 : index
    %c0_4 = arith.constant 0 : index
    %10 = vector.load %arg3[%c0_3, %c0_4] : memref<64x32xf32, #tpu.memory_space<vmem>>, vector<64x32xf32>
    %11 = arith.addf %9, %10 : vector<64x32xf32>
    %cst = arith.constant dense<0.000000e+00> : vector<64xf32>
    %12 = vector.multi_reduction <add>, %11, %cst [1] : vector<64x32xf32> to vector<64xf32>
    %13 = vector.shape_cast %12 : vector<64xf32> to vector<64x1xf32>
    %cst_5 = arith.constant 3.200000e+01 : f32
    %14 = vector.broadcast %cst_5 : f32 to vector<64x1xf32>
    %15 = arith.divf %13, %14 : vector<64x1xf32>
    %16 = vector.broadcast %15 : vector<64x1xf32> to vector<64x32xf32>
    %17 = arith.subf %11, %16 : vector<64x32xf32>
    %18 = arith.mulf %17, %17 : vector<64x32xf32>
    %cst_6 = arith.constant dense<0.000000e+00> : vector<64xf32>
    %19 = vector.multi_reduction <add>, %18, %cst_6 [1] : vector<64x32xf32> to vector<64xf32>
    %20 = vector.shape_cast %19 : vector<64xf32> to vector<64x1xf32>
    %cst_7 = arith.constant 3.200000e+01 : f32
    %21 = vector.broadcast %cst_7 : f32 to vector<64x1xf32>
    %22 = arith.divf %20, %21 : vector<64x1xf32>
    %23 = vector.broadcast %15 : vector<64x1xf32> to vector<64x32xf32>
    %24 = arith.subf %11, %23 : vector<64x32xf32>
    %cst_8 = arith.constant 9.99999974E-6 : f32
    %25 = vector.broadcast %cst_8 : f32 to vector<64x1xf32>
    %26 = arith.addf %22, %25 : vector<64x1xf32>
    %27 = math.rsqrt %26 : vector<64x1xf32>
    %28 = vector.broadcast %27 : vector<64x1xf32> to vector<64x32xf32>
    %29 = arith.mulf %24, %28 : vector<64x32xf32>
    %30 = vector.broadcast %1 : vector<1x32xf32> to vector<64x32xf32>
    %31 = arith.mulf %29, %30 : vector<64x32xf32>
    %32 = vector.broadcast %2 : vector<1x32xf32> to vector<64x32xf32>
    %33 = arith.addf %31, %32 : vector<64x32xf32>
    %c0_9 = arith.constant 0 : index
    %c0_10 = arith.constant 0 : index
    %34 = vector.load %arg5[%c0_9, %c0_10] : memref<32x96xf32, #tpu.memory_space<vmem>>, vector<32x96xf32>
    %cst_11 = arith.constant dense<0.000000e+00> : vector<64x96xf32>
    %35 = tpu.matmul %33, %34, %cst_11 {dimension_numbers = #tpu.dot_dimension_numbers<[1], [0], [0], [1], [0, 0, 1, 1], [], []>} : vector<64x32xf32>, vector<32x96xf32>, vector<64x96xf32> -> vector<64x96xf32>
    %36 = vector.broadcast %3 : vector<1x96xf32> to vector<64x96xf32>
    %37 = arith.addf %35, %36 : vector<64x96xf32>
    %38 = vector.extract_strided_slice %37 {offsets = [0, 0], sizes = [64, 32], strides = [1, 1]} : vector<64x96xf32> to vector<64x32xf32>
    %39 = vector.shape_cast %38 : vector<64x32xf32> to vector<8x8x32xf32>
    %40 = vector.extract_strided_slice %37 {offsets = [0, 32], sizes = [64, 32], strides = [1, 1]} : vector<64x96xf32> to vector<64x32xf32>
    %41 = vector.shape_cast %40 : vector<64x32xf32> to vector<8x8x32xf32>
    %42 = vector.extract_strided_slice %37 {offsets = [0, 64], sizes = [64, 32], strides = [1, 1]} : vector<64x96xf32> to vector<64x32xf32>
    %43 = vector.shape_cast %42 : vector<64x32xf32> to vector<8x8x32xf32>
    "tpu.trace_start"() <{level = 10 : i32, message = "ble,bke->blk"}> : () -> ()
    %cst_12 = arith.constant dense<0.000000e+00> : vector<8x8x8xf32>
    %44 = tpu.matmul %39, %41, %cst_12 {dimension_numbers = #tpu.dot_dimension_numbers<[2], [2], [1], [1], [0, 0, 0, 1, 1, 1], [0], [0]>} : vector<8x8x32xf32>, vector<8x8x32xf32>, vector<8x8x8xf32> -> vector<8x8x8xf32>
    "tpu.trace_stop"() : () -> ()
    %45 = tpu.iota {dimensions = array<i32: 2>} : vector<8x8x8xi32>
    %c0_13 = arith.constant 0 : index
    %c0_14 = arith.constant 0 : index
    %c0_15 = arith.constant 0 : index
    %46 = vector.load %arg2[%c0_13, %c0_14, %c0_15] : memref<8x1x1xi32, #tpu.memory_space<vmem>>, vector<8x1x1xi32>
    %47 = vector.broadcast %46 : vector<8x1x1xi32> to vector<8x8x8xi32>
    %48 = arith.cmpi slt, %45, %47 : vector<8x8x8xi32>
    %cst_16 = arith.constant 0.000000e+00 : f32
    %cst_17 = arith.constant -1.000000e+09 : f32
    %49 = vector.broadcast %cst_16 : f32 to vector<8x8x8xf32>
    %50 = vector.broadcast %cst_17 : f32 to vector<8x8x8xf32>
    %51 = arith.select %48, %49, %50 : vector<8x8x8xi1>, vector<8x8x8xf32>
    %52 = arith.addf %44, %51 : vector<8x8x8xf32>
    %cst_18 = arith.constant dense<0xFF800000> : vector<8x8xf32>
    %53 = vector.multi_reduction <maximumf>, %52, %cst_18 [2] : vector<8x8x8xf32> to vector<8x8xf32>
    %54 = vector.shape_cast %53 : vector<8x8xf32> to vector<8x8x1xf32>
    %55 = vector.broadcast %54 : vector<8x8x1xf32> to vector<8x8x8xf32>
    %56 = arith.subf %52, %55 : vector<8x8x8xf32>
    %57 = math.exp %56 : vector<8x8x8xf32>
    %cst_19 = arith.constant dense<0.000000e+00> : vector<8x8xf32>
    %58 = vector.multi_reduction <add>, %57, %cst_19 [2] : vector<8x8x8xf32> to vector<8x8xf32>
    %59 = vector.shape_cast %58 : vector<8x8xf32> to vector<8x8x1xf32>
    %60 = tpu.reciprocal %59 {approx = true} : vector<8x8x1xf32> -> vector<8x8x1xf32>
    %61 = vector.broadcast %60 : vector<8x8x1xf32> to vector<8x8x8xf32>
    %62 = arith.mulf %57, %61 : vector<8x8x8xf32>
    "tpu.trace_start"() <{level = 10 : i32, message = "blk,bke->ble"}> : () -> ()
    %cst_20 = arith.constant dense<0.000000e+00> : vector<8x8x32xf32>
    %63 = tpu.matmul %62, %43, %cst_20 {dimension_numbers = #tpu.dot_dimension_numbers<[2], [1], [1], [2], [0, 0, 0, 1, 1, 2], [0], [0]>} : vector<8x8x8xf32>, vector<8x8x32xf32>, vector<8x8x32xf32> -> vector<8x8x32xf32>
    "tpu.trace_stop"() : () -> ()
    %64 = vector.extract_strided_slice %63 {offsets = [0, 0, 0], sizes = [8, 1, 32], strides = [1, 1, 1]} : vector<8x8x32xf32> to vector<8x1x32xf32>
    %65 = vector.shape_cast %64 : vector<8x1x32xf32> to vector<8x32xf32>
    %c0_21 = arith.constant 0 : index
    %c0_22 = arith.constant 0 : index
    %66 = vector.load %arg6[%c0_21, %c0_22] : memref<256x50xf32, #tpu.memory_space<vmem>>, vector<32x50xf32>
    %cst_23 = arith.constant dense<0.000000e+00> : vector<8x50xf32>
    %67 = tpu.matmul %65, %66, %cst_23 {dimension_numbers = #tpu.dot_dimension_numbers<[1], [0], [0], [1], [0, 0, 1, 1], [], []>} : vector<8x32xf32>, vector<32x50xf32>, vector<8x50xf32> -> vector<8x50xf32>
    %68 = vector.extract_strided_slice %63 {offsets = [0, 1, 0], sizes = [8, 1, 32], strides = [1, 1, 1]} : vector<8x8x32xf32> to vector<8x1x32xf32>
    %69 = vector.shape_cast %68 : vector<8x1x32xf32> to vector<8x32xf32>
    %c32 = arith.constant 32 : index
    %c0_24 = arith.constant 0 : index
    %70 = vector.load %arg6[%c32, %c0_24] : memref<256x50xf32, #tpu.memory_space<vmem>>, vector<32x50xf32>
    %cst_25 = arith.constant dense<0.000000e+00> : vector<8x50xf32>
    %71 = tpu.matmul %69, %70, %cst_25 {dimension_numbers = #tpu.dot_dimension_numbers<[1], [0], [0], [1], [0, 0, 1, 1], [], []>} : vector<8x32xf32>, vector<32x50xf32>, vector<8x50xf32> -> vector<8x50xf32>
    %72 = vector.extract_strided_slice %63 {offsets = [0, 2, 0], sizes = [8, 1, 32], strides = [1, 1, 1]} : vector<8x8x32xf32> to vector<8x1x32xf32>
    %73 = vector.shape_cast %72 : vector<8x1x32xf32> to vector<8x32xf32>
    %c64 = arith.constant 64 : index
    %c0_26 = arith.constant 0 : index
    %74 = vector.load %arg6[%c64, %c0_26] : memref<256x50xf32, #tpu.memory_space<vmem>>, vector<32x50xf32>
    %cst_27 = arith.constant dense<0.000000e+00> : vector<8x50xf32>
    %75 = tpu.matmul %73, %74, %cst_27 {dimension_numbers = #tpu.dot_dimension_numbers<[1], [0], [0], [1], [0, 0, 1, 1], [], []>} : vector<8x32xf32>, vector<32x50xf32>, vector<8x50xf32> -> vector<8x50xf32>
    %76 = vector.extract_strided_slice %63 {offsets = [0, 3, 0], sizes = [8, 1, 32], strides = [1, 1, 1]} : vector<8x8x32xf32> to vector<8x1x32xf32>
    %77 = vector.shape_cast %76 : vector<8x1x32xf32> to vector<8x32xf32>
    %c96 = arith.constant 96 : index
    %c0_28 = arith.constant 0 : index
    %78 = vector.load %arg6[%c96, %c0_28] : memref<256x50xf32, #tpu.memory_space<vmem>>, vector<32x50xf32>
    %cst_29 = arith.constant dense<0.000000e+00> : vector<8x50xf32>
    %79 = tpu.matmul %77, %78, %cst_29 {dimension_numbers = #tpu.dot_dimension_numbers<[1], [0], [0], [1], [0, 0, 1, 1], [], []>} : vector<8x32xf32>, vector<32x50xf32>, vector<8x50xf32> -> vector<8x50xf32>
    %80 = vector.extract_strided_slice %63 {offsets = [0, 4, 0], sizes = [8, 1, 32], strides = [1, 1, 1]} : vector<8x8x32xf32> to vector<8x1x32xf32>
    %81 = vector.shape_cast %80 : vector<8x1x32xf32> to vector<8x32xf32>
    %c128 = arith.constant 128 : index
    %c0_30 = arith.constant 0 : index
    %82 = vector.load %arg6[%c128, %c0_30] : memref<256x50xf32, #tpu.memory_space<vmem>>, vector<32x50xf32>
    %cst_31 = arith.constant dense<0.000000e+00> : vector<8x50xf32>
    %83 = tpu.matmul %81, %82, %cst_31 {dimension_numbers = #tpu.dot_dimension_numbers<[1], [0], [0], [1], [0, 0, 1, 1], [], []>} : vector<8x32xf32>, vector<32x50xf32>, vector<8x50xf32> -> vector<8x50xf32>
    %84 = vector.extract_strided_slice %63 {offsets = [0, 5, 0], sizes = [8, 1, 32], strides = [1, 1, 1]} : vector<8x8x32xf32> to vector<8x1x32xf32>
    %85 = vector.shape_cast %84 : vector<8x1x32xf32> to vector<8x32xf32>
    %c160 = arith.constant 160 : index
    %c0_32 = arith.constant 0 : index
    %86 = vector.load %arg6[%c160, %c0_32] : memref<256x50xf32, #tpu.memory_space<vmem>>, vector<32x50xf32>
    %cst_33 = arith.constant dense<0.000000e+00> : vector<8x50xf32>
    %87 = tpu.matmul %85, %86, %cst_33 {dimension_numbers = #tpu.dot_dimension_numbers<[1], [0], [0], [1], [0, 0, 1, 1], [], []>} : vector<8x32xf32>, vector<32x50xf32>, vector<8x50xf32> -> vector<8x50xf32>
    %88 = vector.extract_strided_slice %63 {offsets = [0, 6, 0], sizes = [8, 1, 32], strides = [1, 1, 1]} : vector<8x8x32xf32> to vector<8x1x32xf32>
    %89 = vector.shape_cast %88 : vector<8x1x32xf32> to vector<8x32xf32>
    %c192 = arith.constant 192 : index
    %c0_34 = arith.constant 0 : index
    %90 = vector.load %arg6[%c192, %c0_34] : memref<256x50xf32, #tpu.memory_space<vmem>>, vector<32x50xf32>
    %cst_35 = arith.constant dense<0.000000e+00> : vector<8x50xf32>
    %91 = tpu.matmul %89, %90, %cst_35 {dimension_numbers = #tpu.dot_dimension_numbers<[1], [0], [0], [1], [0, 0, 1, 1], [], []>} : vector<8x32xf32>, vector<32x50xf32>, vector<8x50xf32> -> vector<8x50xf32>
    %92 = vector.extract_strided_slice %63 {offsets = [0, 7, 0], sizes = [8, 1, 32], strides = [1, 1, 1]} : vector<8x8x32xf32> to vector<8x1x32xf32>
    %93 = vector.shape_cast %92 : vector<8x1x32xf32> to vector<8x32xf32>
    %c224 = arith.constant 224 : index
    %c0_36 = arith.constant 0 : index
    %94 = vector.load %arg6[%c224, %c0_36] : memref<256x50xf32, #tpu.memory_space<vmem>>, vector<32x50xf32>
    %cst_37 = arith.constant dense<0.000000e+00> : vector<8x50xf32>
    %95 = tpu.matmul %93, %94, %cst_37 {dimension_numbers = #tpu.dot_dimension_numbers<[1], [0], [0], [1], [0, 0, 1, 1], [], []>} : vector<8x32xf32>, vector<32x50xf32>, vector<8x50xf32> -> vector<8x50xf32>
    %96 = arith.addf %67, %71 : vector<8x50xf32>
    %97 = arith.addf %75, %79 : vector<8x50xf32>
    %98 = arith.addf %83, %87 : vector<8x50xf32>
    %99 = arith.addf %91, %95 : vector<8x50xf32>
    %100 = arith.addf %96, %97 : vector<8x50xf32>
    %101 = arith.addf %98, %99 : vector<8x50xf32>
    %102 = arith.addf %100, %101 : vector<8x50xf32>
    %103 = vector.broadcast %4 : vector<1x50xf32> to vector<8x50xf32>
    %104 = arith.addf %102, %103 : vector<8x50xf32>
    %cst_38 = arith.constant 0.000000e+00 : f32
    %105 = vector.broadcast %cst_38 : f32 to vector<8x50xf32>
    %106 = arith.maximumf %104, %105 : vector<8x50xf32>
    %107 = vector.broadcast %7 : vector<1x50xf32> to vector<8x50xf32>
    %108 = arith.mulf %106, %107 : vector<8x50xf32>
    %cst_39 = arith.constant dense<0.000000e+00> : vector<8xf32>
    %109 = vector.multi_reduction <add>, %108, %cst_39 [1] : vector<8x50xf32> to vector<8xf32>
    %110 = vector.shape_cast %109 : vector<8xf32> to vector<8x1xf32>
    %111 = vector.broadcast %5 : vector<1x1xf32> to vector<8x1xf32>
    %112 = arith.addf %110, %111 : vector<8x1xf32>
    %113 = vector.broadcast %8 : vector<1x50xf32> to vector<8x50xf32>
    %114 = arith.mulf %106, %113 : vector<8x50xf32>
    %cst_40 = arith.constant dense<0.000000e+00> : vector<8xf32>
    %115 = vector.multi_reduction <add>, %114, %cst_40 [1] : vector<8x50xf32> to vector<8xf32>
    %116 = vector.shape_cast %115 : vector<8xf32> to vector<8x1xf32>
    %117 = vector.broadcast %6 : vector<1x1xf32> to vector<8x1xf32>
    %118 = arith.addf %116, %117 : vector<8x1xf32>
    %119 = tpu.iota {dimensions = array<i32: 1>} : vector<8x128xi32>
    %c0_i32 = arith.constant 0 : i32
    %120 = vector.broadcast %c0_i32 : i32 to vector<8x128xi32>
    %121 = arith.cmpi eq, %119, %120 : vector<8x128xi32>
    %c1_i32 = arith.constant 1 : i32
    %122 = vector.broadcast %c1_i32 : i32 to vector<8x128xi32>
    %123 = arith.cmpi eq, %119, %122 : vector<8x128xi32>
    %cst_41 = arith.constant -1.000000e+09 : f32
    %124 = vector.shape_cast %118 : vector<8x1xf32> to vector<8x1xf32>
    %125 = vector.broadcast %124 : vector<8x1xf32> to vector<8x128xf32>
    %126 = vector.broadcast %cst_41 : f32 to vector<8x128xf32>
    %127 = arith.select %123, %125, %126 : vector<8x128xi1>, vector<8x128xf32>
    %128 = vector.shape_cast %112 : vector<8x1xf32> to vector<8x1xf32>
    %129 = vector.broadcast %128 : vector<8x1xf32> to vector<8x128xf32>
    %130 = arith.select %121, %129, %127 : vector<8x128xi1>, vector<8x128xf32>
    %cst_42 = arith.constant dense<0xFF800000> : vector<8xf32>
    %131 = vector.multi_reduction <maximumf>, %130, %cst_42 [1] : vector<8x128xf32> to vector<8xf32>
    %132 = vector.shape_cast %131 : vector<8xf32> to vector<8x1xf32>
    %133 = vector.broadcast %132 : vector<8x1xf32> to vector<8x128xf32>
    %134 = arith.subf %130, %133 : vector<8x128xf32>
    %135 = math.exp %134 : vector<8x128xf32>
    %cst_43 = arith.constant dense<0.000000e+00> : vector<8xf32>
    %136 = vector.multi_reduction <add>, %135, %cst_43 [1] : vector<8x128xf32> to vector<8xf32>
    %137 = vector.shape_cast %136 : vector<8xf32> to vector<8x1xf32>
    %138 = tpu.reciprocal %137 : vector<8x1xf32> -> vector<8x1xf32>
    %139 = vector.broadcast %138 : vector<8x1xf32> to vector<8x128xf32>
    %140 = arith.mulf %135, %139 : vector<8x128xf32>
    %c0_44 = arith.constant 0 : index
    %c0_45 = arith.constant 0 : index
    %141 = vector.load %arg7[%c0_44, %c0_45] : memref<8x128xf32, #tpu.memory_space<vmem>>, vector<8x128xf32>
    tpu.vector_store %arg7[%c0_44, %c0_45], %140 {strides = array<i32>} : memref<8x128xf32, #tpu.memory_space<vmem>>, vector<8x128xf32>,
    return
  }
  func.func @transform_0(%arg0: i32) -> (i32, i32) {
    %c0_i32 = arith.constant 0 : i32
    %c0_i32_0 = arith.constant 0 : i32
    return %arg0, %c0_i32 : i32, i32
  }
  func.func @transform_1(%arg0: i32) -> (i32, i32, i32) {
    %c0_i32 = arith.constant 0 : i32
    %c0_i32_0 = arith.constant 0 : i32
    %c0_i32_1 = arith.constant 0 : i32
    return %arg0, %c0_i32, %c0_i32_0 : i32, i32, i32
  }
  func.func @transform_2(%arg0: i32) -> (i32, i32) {
    %c0_i32 = arith.constant 0 : i32
    %c0_i32_0 = arith.constant 0 : i32
    %c0_i32_1 = arith.constant 0 : i32
    return %c0_i32, %c0_i32_0 : i32, i32
  }
  func.func @transform_3(%arg0: i32) -> (i32, i32) {
    %c0_i32 = arith.constant 0 : i32
    %c0_i32_0 = arith.constant 0 : i32
    %c0_i32_1 = arith.constant 0 : i32
    return %c0_i32, %c0_i32_0 : i32, i32
  }
  func.func @transform_4(%arg0: i32) -> (i32, i32) {
    %c0_i32 = arith.constant 0 : i32
    %c0_i32_0 = arith.constant 0 : i32
    %c0_i32_1 = arith.constant 0 : i32
    return %c0_i32, %c0_i32_0 : i32, i32
  }
  func.func @transform_5(%arg0: i32) -> (i32, i32) {
    %c0_i32 = arith.constant 0 : i32
    %c0_i32_0 = arith.constant 0 : i32
    %c0_i32_1 = arith.constant 0 : i32
    return %c0_i32, %c0_i32_0 : i32, i32
  }
  func.func @transform_6(%arg0: i32) -> (i32, i32) {
    %c0_i32 = arith.constant 0 : i32
    %c0_i32_0 = arith.constant 0 : i32
    return %arg0, %c0_i32 : i32, i32
  }
}

</mosaic_0001>

<bundles_post_ra>
// kernel: forward.1
= control target key start
LH: loop header
LB: loop body
LE: loop exit
PB: predicated region body
PF: predicated region fallthrough
CT: control target
= control target key end

     0   :  { %s3322_s21 = smov 0   ;;  %s3921_s0 = inlined_call_operand.vmem [shape: f32[256,32], index: 0, kind: input, shape index: {}]   ;;  %s3922_s1 = inlined_call_operand.vmem [shape: s32[32,1,1], index: 1, kind: input, shape index: {}]   ;;  %s3923_s2 = inlined_call_operand.vmem [shape: f32[64,32], index: 2, kind: input, shape index: {}]   ;;  %s3924_s3 = inlined_call_operand.vmem [shape: f32[8,96], index: 3, kind: input, shape index: {}]   ;;  %s3925_s4 = inlined_call_operand.vmem [shape: f32[32,96], index: 4, kind: input, shape index: {}]   ;;  %s3926_s5 = inlined_call_operand.vmem [shape: f32[256,50], index: 5, kind: input, shape index: {}]   ;;  %s3927_s6 = inlined_call_operand.vmem [shape: f32[32,128], index: 6, kind: output, shape index: {}]  }
   0x1 LB: > { %s3328_s22 = sadd.s32 4294967295, %s3277_s21   ;;  %p2815_p0 = scmp.ge.s32.totalorder %s3277_s21, 1  ;;  %s3277_s21 = sphi %s3322_s21, %s16_s21  }
   0x2   : > { %p223_p1 = scmp.lt.s32.totalorder %s3277_s21, 5 }
   0x4   : > { %p224_p2 = pnand %p2815_p0, %p223_p1 }
   0x5   : > { %s2816_s23 = sshll.u32 (!%p224_p2), %s3328_s22, 3  ;;  %v280_v0 = vld [vmem:[%s3923_s2] sm:$0xff] (!%p224_p2)  ;;  %v282_v1 = vld [vmem:[%s3923_s2 + $0x10] sm:$0xff] (!%p224_p2)  ;;  %v281_v2 = vld [vmem:[%s3923_s2 + $0x8] sm:$0xff] (!%p224_p2)  ;;  %vm296_vm0 = vcmask (!%p224_p2), 261120   ;;  %vm3280_vm1 = vmmov (!%p224_p2), 0  }
   0x6   : > { %227 = sbr.rel (%p224_p2) target bundleno = 2281 (0x8e9), region = 44  ;;  %p257_p3 = scmp.lt.s32.totalorder (!%p224_p2), %s2816_s23, 31  ;;  %v283_v3 = vld [vmem:[%s3923_s2 + $0x18] sm:$0xff] (!%p224_p2)  ;;  %v284_v11 = vld [vmem:[%s3923_s2 + $0x20] sm:$0xff] (!%p224_p2)  ;;  %v285_v15 = vld [vmem:[%s3923_s2 + $0x28] sm:$0xff] (!%p224_p2)  ;;  %vm1261_vm4 = vcmask (!%p224_p2), 64512  }
   0x7   : > { %v286_v22 = vld [vmem:[%s3923_s2 + $0x30] sm:$0xff] (!%p224_p2)  ;;  %v287_v25 = vld [vmem:[%s3923_s2 + $0x38] sm:$0xff] (!%p224_p2)  ;;  %vm1975_vm11 = vcmask (!%p224_p2), 1041409   ;;  %vm1978_vm12 = vcmask (!%p224_p2), 1042434   ;;  %vm1981_vm13 = vcmask (!%p224_p2), 1043459   ;;  %vm1984_vm14 = vcmask (!%p224_p2), 1044484  }
   0x8   : > { %vm1987_vm15 = vcmask (!%p224_p2), 1045509   ;;  %p267_p4 = scmp.lt.s32.totalorder (!%p224_p2), %s3328_s22, 3 }
   0xd   : > { %s3929_s23 = smov (!%p257_p3, %s2816_s23), 31  ;;  %s3931_s22 = smov (!%p267_p4, %s3328_s22), 3 }
   0xe   : > { %s2817_s24 = sshll.u32 %s3929_s23, 3  ;;  %s265_s12 = scalar_lea.vmem %s3922_s1, %s3929_s23 }
   0xf   : > { %s260_s9 = scalar_lea.vmem %s3921_s0, %s2817_s24  ;;  %s3284_s23 = smov 64  }
  0x10   : > { %v272_v4 = vld [vmem:[%s260_s9] sm:$0xff]  ;;  %v274_v5 = vld [vmem:[%s260_s9 + $0x10] sm:$0xff]  ;;  %v273_v6 = vld [vmem:[%s260_s9 + $0x8] sm:$0xff]  ;;  %s2819_s13 = sshll.u32 %s3931_s22, 3 }
  0x11   : > { %v288_v7 = vadd.f32 %v280_v0, %v272_v4  ;;  %v290_v8 = vadd.f32 %v282_v1, %v274_v5  ;;  %v289_v9 = vadd.f32 %v281_v2, %v273_v6  ;;  %v275_v10 = vld [vmem:[%s260_s9 + $0x18] sm:$0xff]  ;;  %v276_v13 = vld [vmem:[%s260_s9 + $0x20] sm:$0xff]  ;;  %v277_v14 = vld [vmem:[%s260_s9 + $0x28] sm:$0xff]  ;;  %s270_s16 = scalar_lea.vmem %s3927_s6, %s2819_s13 }
  0x12   : > { %v291_v12 = vadd.f32 %v283_v3, %v275_v10  ;;  %v292_v20 = vadd.f32 %v284_v11, %v276_v13  ;;  %v293_v21 = vadd.f32 %v285_v15, %v277_v14  ;;  %v278_v23 = vld [vmem:[%s260_s9 + $0x30] sm:$0xff]  ;;  %v279_v24 = vld [vmem:[%s260_s9 + $0x38] sm:$0xff]  ;;  %s3281_s9 = smov 96  }
  0x13   : > { %v297_v16 = vsel %vm296_vm0, %v288_v7, 0.0  ;;  %v303_v17 = vsel %vm296_vm0, %v290_v8, 0.0  ;;  %v300_v18 = vsel %vm296_vm0, %v289_v9, 0.0  ;;  %v294_v28 = vadd.f32 %v286_v22, %v278_v23  ;;  %v428_v11 = vld [vmem:[%s3925_s4 + $0x10] sm:$0xff] }
  0x14   : > { %298 = vadd.xlane.f32.xlu0 %v297_v16  ;;  %304 = vadd.xlane.f32.xlu1 %v303_v17  ;;  %v306_v19 = vsel %vm296_vm0, %v291_v12, 0.0  ;;  %v309_v26 = vsel %vm296_vm0, %v292_v20, 0.0  ;;  %v312_v27 = vsel %vm296_vm0, %v293_v21, 0.0  ;;  %v295_v29 = vadd.f32 %v287_v25, %v279_v24 }
  0x15   : > { %v315_v30 = vsel %vm296_vm0, %v294_v28, 0.0  ;;  %v402_v16 = vlaneseq }
  0x16   : > { %v318_v31 = vsel %vm296_vm0, %v295_v29, 0.0 }
  0x17   : > { %v3424_v22 = vshrl.u32 %v402_v16, 7 }
  0x18   : > { %301 = vadd.xlane.f32.xlu0 %v300_v18  ;;  %307 = vadd.xlane.f32.xlu1 %v306_v19 }
  0x1c   : > { %310 = vadd.xlane.f32.xlu0 %v309_v26  ;;  %313 = vadd.xlane.f32.xlu1 %v312_v27 }
  0x20   : > { %316 = vadd.xlane.f32.xlu0 %v315_v30  ;;  %319 = vadd.xlane.f32.xlu1 %v318_v31 }
  0xa1   : > { %v299_v32 = vpop.xlane.xlu0 %298  ;;  %v305_v33 = vpop.xlane.xlu1 %304 }
  0xa2   : > { %v322_v34 = vmul.f32 0.03125, %v299_v32  ;;  %v324_v35 = vmul.f32 0.03125, %v305_v33  ;;  %v3430_v32 = vld [vmem:[%s3924_s3] sm:$0xff] }
  0xa4   : > { %v3371_v36 = vsub.f32 %v288_v7, %v322_v34  ;;  %v3373_v37 = vsub.f32 %v290_v8, %v324_v35  ;;  %v426_v8 = vld [vmem:[%s3925_s4] sm:$0xff]  ;;  %v416_v35 = vsub.s32 1, %v3424_v22 }
  0xa5   : > { %v302_v38 = vpop.xlane.xlu0 %301  ;;  %v308_v39 = vpop.xlane.xlu1 %307 }
  0xa6   : > { %v323_v40 = vmul.f32 0.03125, %v302_v38  ;;  %v325_v41 = vmul.f32 0.03125, %v308_v39  ;;  %v338_v42 = vmul.f32 %v3371_v36, %v3371_v36  ;;  %v340_v43 = vmul.f32 %v3373_v37, %v3373_v37 }
  0xa8   : > { %v3379_v44 = vsub.f32 %v289_v9, %v323_v40  ;;  %v3381_v45 = vsub.f32 %v291_v12, %v325_v41  ;;  %v346_v46 = vsel %vm296_vm0, %v338_v42, 0.0  ;;  %v352_v49 = vsel %vm296_vm0, %v340_v43, 0.0  ;;  %v427_v9 = vld [vmem:[%s3925_s4 + $0x8] sm:$0xff]  ;;  %v429_v12 = vld [vmem:[%s3925_s4 + $0x18] sm:$0xff] }
  0xa9   : > { %347 = vadd.xlane.f32.xlu0 %v346_v46  ;;  %v311_v47 = vpop.xlane.xlu0 %310  ;;  %v314_v48 = vpop.xlane.xlu1 %313  ;;  %v3142_v10 = vpack.c.bf16 %v427_v9, %v426_v8  ;;  %v3146_v13 = vpack.c.bf16 %v429_v12, %v428_v11 }
  0xaa   : > { %v326_v50 = vmul.f32 0.03125, %v311_v47  ;;  %v327_v51 = vmul.f32 0.03125, %v314_v48  ;;  %v339_v52 = vmul.f32 %v3379_v44, %v3379_v44  ;;  %v341_v53 = vmul.f32 %v3381_v45, %v3381_v45 }
  0xab   : > { %3143 = vmatprep.subr.bf16.mxu0 %v3142_v10  ;;  %v417_v48 = vrot.slane %v3430_v32, %v416_v35 }
  0xac   : > { %v3389_v54 = vsub.f32 %v292_v20, %v326_v50  ;;  %v3391_v55 = vsub.f32 %v293_v21, %v327_v51  ;;  %v349_v56 = vsel %vm296_vm0, %v339_v52, 0.0  ;;  %v355_v59 = vsel %vm296_vm0, %v341_v53, 0.0  ;;  %3145 = vmatpush3.bf16.msra.mxu0 %v3142_v10 }
  0xad   : > { %353 = vadd.xlane.f32.xlu0 %v352_v49  ;;  %350 = vadd.xlane.f32.xlu1 %v349_v56  ;;  %v317_v57 = vpop.xlane.xlu0 %316  ;;  %v320_v58 = vpop.xlane.xlu1 %319 }
  0xae   : > { %v328_v60 = vmul.f32 0.03125, %v317_v57  ;;  %v329_v61 = vmul.f32 0.03125, %v320_v58  ;;  %v342_v62 = vmul.f32 %v3389_v54, %v3389_v54  ;;  %v343_v63 = vmul.f32 %v3391_v55, %v3391_v55  ;;  %3147 = vmatprep.subr.bf16.mxu0 %v3146_v13 }
  0xb0   : > { %v3399_v0 = vsub.f32 %v294_v28, %v328_v60  ;;  %v3401_v1 = vsub.f32 %v295_v29, %v329_v61  ;;  %v358_v2 = vsel %vm296_vm0, %v342_v62, 0.0  ;;  %v361_v3 = vsel %vm296_vm0, %v343_v63, 0.0  ;;  %3149 = vmatpush3.bf16.msra.mxu0 %v3146_v13 }
  0xb1   : > { %356 = vadd.xlane.f32.xlu1 %v355_v59  ;;  %359 = vadd.xlane.f32.xlu0 %v358_v2  ;;  %v404_v29 = vsub.s32 0, %v3424_v22 }
  0xb2   : > { %v344_v4 = vmul.f32 %v3399_v0, %v3399_v0  ;;  %v345_v5 = vmul.f32 %v3401_v1, %v3401_v1 }
  0xb3   : > { %v405_v40 = vrot.slane %v3430_v32, %v404_v29 }
  0xb4   : > { %v364_v6 = vsel %vm296_vm0, %v344_v4, 0.0  ;;  %v367_v7 = vsel %vm296_vm0, %v345_v5, 0.0 }
  0xb5   : > { %362 = vadd.xlane.f32.xlu1 %v361_v3  ;;  %365 = vadd.xlane.f32.xlu0 %v364_v6 }
  0xb9   : > { %368 = vadd.xlane.f32.xlu1 %v367_v7 }
 0x136   : > { %v348_v14 = vpop.xlane.xlu0 %347 }
 0x137   : > { %v370_v15 = vmul.f32 0.03125, %v348_v14 }
 0x139   : > { %v378_v17 = vadd.f32 1e-05, %v370_v15 }
 0x13a   : > { %v351_v18 = vpop.xlane.xlu1 %350  ;;  %v354_v19 = vpop.xlane.xlu0 %353 }
 0x13b   : > { %3218 = vrsqrt.f32 %v378_v17  ;;  %v371_v20 = vmul.f32 0.03125, %v351_v18  ;;  %v372_v21 = vmul.f32 0.03125, %v354_v19 }
 0x13d   : > { %v379_v23 = vadd.f32 1e-05, %v371_v20  ;;  %v380_v24 = vadd.f32 1e-05, %v372_v21 }
 0x13e   : > { %v357_v25 = vpop.xlane.xlu1 %356  ;;  %v360_v26 = vpop.xlane.xlu0 %359 }
 0x13f   : > { %3220 = vrsqrt.f32 %v379_v23  ;;  %v373_v27 = vmul.f32 0.03125, %v357_v25  ;;  %v374_v28 = vmul.f32 0.03125, %v360_v26 }
 0x140   : > { %3222 = vrsqrt.f32 %v380_v24 }
 0x141   : > { %v381_v30 = vadd.f32 1e-05, %v373_v27  ;;  %v382_v31 = vadd.f32 1e-05, %v374_v28 }
 0x142   : > { %v363_v33 = vpop.xlane.xlu1 %362  ;;  %v366_v34 = vpop.xlane.xlu0 %365 }
 0x143   : > { %3224 = vrsqrt.f32 %v381_v30  ;;  %v375_v38 = vmul.f32 0.03125, %v363_v33  ;;  %v376_v39 = vmul.f32 0.03125, %v366_v34  ;;  %v3282_v33 = vmov 0   ;;  %v2828_v34 = vld [vmem:[%s265_s12] ss:$0 sm:$0xff] }
 0x144   : > { %3226 = vrsqrt.f32 %v382_v31  ;;  %3214 = vset.pattern.permute.xlu0 %v3282_v33  ;;  %3215 = vset.pattern.permute.xlu1 %v3282_v33 }
 0x145   : > { %v3219_v41 = vpop.eup %3218  ;;  %v383_v42 = vadd.f32 1e-05, %v375_v38  ;;  %v384_v43 = vadd.f32 1e-05, %v376_v39  ;;  %v2829_v38 = vld [vmem:[%s265_s12 + $0x1] ss:$0 sm:$0xff] }
 0x146   : > { %v369_v46 = vpop.xlane.xlu1 %368  ;;  %v394_v47 = vmul.f32 %v3219_v41, %v3371_v36  ;;  %v2831_v39 = vld [vmem:[%s265_s12 + $0x3] ss:$0 sm:$0xff]  ;;  %v2833_v41 = vld [vmem:[%s265_s12 + $0x5] ss:$0 sm:$0xff] }
 0x147   : > { %3228 = vrsqrt.f32 %v383_v42  ;;  %v377_v49 = vmul.f32 0.03125, %v369_v46  ;;  %v2832_v42 = vld [vmem:[%s265_s12 + $0x4] ss:$0 sm:$0xff]  ;;  %v2834_v46 = vld [vmem:[%s265_s12 + $0x6] ss:$0 sm:$0xff] }
 0x148   : > { %3230 = vrsqrt.f32 %v384_v43  ;;  %v406_v50 = vmul.f32 %v405_v40, %v394_v47  ;;  %v2835_v43 = vld [vmem:[%s265_s12 + $0x7] ss:$0 sm:$0xff] }
 0x149   : > { %v3221_v51 = vpop.eup %3220  ;;  %v385_v52 = vadd.f32 1e-05, %v377_v49 }
 0x14a   : > { %v3223_v53 = vpop.eup %3222  ;;  %v418_v56 = vadd.f32 %v417_v48, %v406_v50  ;;  %v395_v57 = vmul.f32 %v3221_v51, %v3379_v44 }
 0x14b   : > { %3232 = vrsqrt.f32 %v385_v52  ;;  %v396_v58 = vmul.f32 %v3223_v53, %v3373_v37 }
 0x14c   : > { %2962 = vmatprep.mubr.msk.f32.mxu0 %vm296_vm0, %v418_v56  ;;  %v407_v59 = vmul.f32 %v405_v40, %v395_v57  ;;  %v3538_v57 = vand.u32 127, %v402_v16 }
 0x14d   : > { %v3225_v60 = vpop.eup %3224  ;;  %v408_v36 = vmul.f32 %v405_v40, %v396_v58 }
 0x14e   : > { %v3227_v61 = vpop.eup %3226  ;;  %v419_v62 = vadd.f32 %v417_v48, %v407_v59  ;;  %v397_v63 = vmul.f32 %v3225_v60, %v3381_v45  ;;  %v3283_v60 = vmov -1e+09  }
 0x14f   : > { %v420_v2 = vadd.f32 %v417_v48, %v408_v36  ;;  %v398_v3 = vmul.f32 %v3227_v61, %v3389_v54 }
 0x150   : > { %2963 = vmatmul.mubr.msk.f32.vlgmr.msra.gmra.mrb[0].mxu0 %vm296_vm0, %v419_v62  ;;  %v409_v4 = vmul.f32 %v405_v40, %v397_v63 }
 0x151   : > { %v3229_v5 = vpop.eup %3228  ;;  %2965 = vmatprep.mubr.msk.f32.mxu0 %vm296_vm0, %v420_v2  ;;  %v410_v44 = vmul.f32 %v405_v40, %v398_v3 }
 0x152   : > { %v3231_v37 = vpop.eup %3230  ;;  %v421_v6 = vadd.f32 %v417_v48, %v409_v4  ;;  %v399_v7 = vmul.f32 %v3229_v5, %v3391_v55 }
 0x153   : > { %v422_v8 = vadd.f32 %v417_v48, %v410_v44  ;;  %v400_v9 = vmul.f32 %v3231_v37, %v3399_v0  ;;  %v3279_v0 = vmov 0.0  }
 0x154   : > { %2966 = vmatmul.mubr.msk.f32.gmra.mrb[2].mxu0 %vm296_vm0, %v421_v6  ;;  %v411_v45 = vmul.f32 %v405_v40, %v399_v7  ;;  %2974 = vmatprep.subr.mxu1 %v3279_v0 }
 0x155   : > { %v3233_v10 = vpop.eup %3232  ;;  %2968 = vmatprep.mubr.msk.f32.mxu0 %vm296_vm0, %v422_v8  ;;  %v412_v54 = vmul.f32 %v405_v40, %v400_v9  ;;  %2999 = vmatprep.subr.mxu0 %v3279_v0 }
 0x156   : > { %v423_v11 = vadd.f32 %v417_v48, %v411_v45  ;;  %v401_v12 = vmul.f32 %v3233_v10, %v3401_v1  ;;  %2976 = vmatprep.mubr.msk.f32.mxu1 %vm3280_vm1, %v3279_v0  ;;  %v432_v1 = vsub.s32 2, %v3424_v22 }
 0x157   : > { %v424_v13 = vadd.f32 %v417_v48, %v412_v54 }
 0x158   : > { %2969 = vmatmul.mubr.msk.f32.gmra.mrb[4].mxu0 %vm296_vm0, %v423_v11  ;;  %v413_v14 = vmul.f32 %v405_v40, %v401_v12  ;;  %v433_v15 = vrot.slane %v3430_v32, %v432_v1  ;;  %v2830_v40 = vld [vmem:[%s265_s12 + $0x2] ss:$0 sm:$0xff] }
 0x159   : > { %2971 = vmatprep.mubr.msk.f32.mxu0 %vm296_vm0, %v424_v13 }
 0x15a   : > { %v425_v55 = vadd.f32 %v417_v48, %v413_v14 }
 0x15c   : > { %2972 = vmatmul.mubr.msk.f32.gmra.mrb[6].mxu0 %vm296_vm0, %v425_v55 }
 0x15d   : > { %3001 = vmatprep.mubr.msk.f32.mxu0 %vm3280_vm1, %v3279_v0 }
 0x223   : > { %v2964_v17 = vpop.f32.mrb[0].mxu0 }
 0x224   : > { %v3459_v18 = vadd.f32 %v2964_v17, %v433_v15  ;;  %v524_v19 = vpop.f32.mrb[1].mxu0 }
 0x225   : > { %v3461_v20 = vadd.f32 %v524_v19, %v433_v15 }
 0x226   : > { %723 = vrot.lane.b32.xlu1 %v3459_v18, %s3281_s9 }
 0x227   : > { %646 = vrot.lane.b32.xlu0 %v3461_v20, %s3281_s9  ;;  %v2967_v21 = vpop.f32.mrb[2].mxu0 }
 0x228   : > { %v534_v23 = vpop.f32.mrb[3].mxu0  ;;  %v3468_v27 = vadd.f32 %v2967_v21, %v433_v15 }
 0x229   : > { %v3465_v24 = vadd.f32 %v534_v23, %v433_v15 }
 0x22b   : > { %800 = vrot.lane.b32.xlu1 %v3465_v24, %s3281_s9  ;;  %v2970_v25 = vpop.f32.mrb[4].mxu0 }
 0x22c   : > { %v544_v26 = vpop.f32.mrb[5].mxu0  ;;  %v3474_v31 = vadd.f32 %v2970_v25, %v433_v15 }
 0x22d   : > { %v3470_v28 = vadd.f32 %v544_v26, %v433_v15 }
 0x22f   : > { %877 = vrot.lane.b32.xlu1 %v3468_v27, %s3281_s9  ;;  %954 = vrot.lane.b32.xlu0 %v3470_v28, %s3281_s9  ;;  %v2973_v29 = vpop.f32.mrb[6].mxu0 }
 0x230   : > { %v554_v30 = vpop.f32.mrb[7].mxu0  ;;  %v3486_v35 = vadd.f32 %v2973_v29, %v433_v15 }
 0x231   : > { %v3476_v32 = vadd.f32 %v554_v30, %v433_v15 }
 0x233   : > { %1031 = vrot.lane.b32.xlu1 %v3474_v31, %s3281_s9  ;;  %1108 = vrot.lane.b32.xlu0 %v3476_v32, %s3281_s9 }
 0x237   : > { %1185 = vrot.lane.b32.xlu1 %v3486_v35, %s3281_s9  ;;  %606 = vperm.xlu0 %3214, %v2828_v34  }
 0x23b   : > { %609 = vperm.xlu1 %3215, %v2829_v38   ;;  %615 = vperm.xlu0 %3214, %v2831_v39  }
 0x23f   : > { %612 = vperm.xlu1 %3215, %v2830_v40   ;;  %621 = vperm.xlu0 %3214, %v2833_v41  }
 0x243   : > { %618 = vperm.xlu1 %3215, %v2832_v42   ;;  %627 = vperm.xlu0 %3214, %v2835_v43  }
 0x247   : > { %624 = vperm.xlu1 %3215, %v2834_v46  }
 0x298   : > { %v724_v47 = vpop.permute.xlu1 %723 }
 0x299   : > { %v647_v48 = vpop.permute.xlu0 %646 }
 0x29a   : > { %2975 = vmatpush3.xpose.msk.msra.mxu1 %vm296_vm0, %v647_v48 }
 0x29b   : > { %2979 = vmatprep.subr.mxu1 %v3279_v0 }
 0x29d   : > { %v801_v49 = vpop.permute.xlu1 %800  ;;  %2977 = vmatmul.mubr.msk.f32.vlgmr.msra.gmra.mrb[0].mxu1 %vm296_vm0, %v3461_v20 }
 0x29e   : > { %2980 = vmatpush3.xpose.msk.msra.mxu1 %vm296_vm0, %v724_v47  ;;  %2981 = vmatprep.mubr.msk.f32.mxu1 %vm3280_vm1, %v3279_v0 }
 0x29f   : > { %2984 = vmatprep.subr.mxu1 %v3279_v0 }
 0x2a1   : > { %v878_v50 = vpop.permute.xlu1 %877  ;;  %2982 = vmatmul.mubr.msk.f32.vlgmr.msra.gmra.mrb[2].mxu1 %vm296_vm0, %v3459_v18  ;;  %v955_v52 = vpop.permute.xlu0 %954 }
 0x2a2   : > { %2985 = vmatpush3.xpose.msk.msra.mxu1 %vm296_vm0, %v801_v49  ;;  %2986 = vmatprep.mubr.msk.f32.mxu1 %vm3280_vm1, %v3279_v0 }
 0x2a3   : > { %2989 = vmatprep.subr.mxu1 %v3279_v0 }
 0x2a5   : > { %v1032_v51 = vpop.permute.xlu1 %1031  ;;  %2987 = vmatmul.mubr.msk.f32.vlgmr.msra.gmra.mrb[4].mxu1 %vm296_vm0, %v3465_v24  ;;  %v1109_v56 = vpop.permute.xlu0 %1108 }
 0x2a6   : > { %2990 = vmatpush3.xpose.msk.msra.mxu1 %vm296_vm0, %v878_v50  ;;  %3000 = vmatpush3.xpose.msk.msra.mxu0 %vm296_vm0, %v1032_v51 }
 0x2a7   : > { %2991 = vmatprep.mubr.msk.f32.mxu1 %vm3280_vm1, %v3279_v0  ;;  %3009 = vmatprep.subr.mxu0 %v3279_v0 }
 0x2a8   : > { %2994 = vmatprep.subr.mxu1 %v3279_v0 }
 0x2a9   : > { %3002 = vmatmul.mubr.msk.f32.vlgmr.msra.gmra.mrb[8].mxu0 %vm296_vm0, %v3474_v31  ;;  %v1186_v53 = vpop.permute.xlu1 %1185  ;;  %2992 = vmatmul.mubr.msk.f32.vlgmr.msra.gmra.mrb[6].mxu1 %vm296_vm0, %v3468_v27 }
 0x2aa   : > { %2995 = vmatpush3.xpose.msk.msra.mxu1 %vm296_vm0, %v955_v52  ;;  %3010 = vmatpush3.xpose.msk.msra.mxu0 %vm296_vm0, %v1186_v53 }
 0x2ab   : > { %2996 = vmatprep.mubr.msk.f32.mxu1 %vm3280_vm1, %v3279_v0  ;;  %3011 = vmatprep.mubr.msk.f32.mxu0 %vm3280_vm1, %v3279_v0 }
 0x2ac   : > { %3004 = vmatprep.subr.mxu1 %v3279_v0  ;;  %3019 = vmatprep.subr.mxu0 %v3279_v0 }
 0x2ad   : > { %2997 = vmatmul.mubr.msk.f32.vlgmr.msra.gmra.mrb[8].mxu1 %vm296_vm0, %v3470_v28  ;;  %3012 = vmatmul.mubr.msk.f32.vlgmr.msra.gmra.mrb[10].mxu0 %vm296_vm0, %v3486_v35 }
 0x2ae   : > { %3005 = vmatpush3.xpose.msk.msra.mxu1 %vm296_vm0, %v1109_v56  ;;  %3006 = vmatprep.mubr.msk.f32.mxu1 %vm3280_vm1, %v3279_v0 }
 0x2af   : > { %3014 = vmatprep.subr.mxu1 %v3279_v0  ;;  %3021 = vmatprep.mubr.msk.f32.mxu0 %vm3280_vm1, %v3279_v0 }
 0x2b1   : > { %3007 = vmatmul.mubr.msk.f32.vlgmr.msra.gmra.mrb[10].mxu1 %vm296_vm0, %v3476_v32 }
 0x2b2   : > { %3016 = vmatprep.mubr.msk.f32.mxu1 %vm3280_vm1, %v3279_v0 }
 0x2b6   : > { %v607_v58 = vpop.permute.xlu0 %606 }
 0x2b7   : > { %vm629_vm2 = vcmp.lt.s32.totalorder %v3538_v57, %v607_v58 }
 0x2b8   : > { %v637_v36 = vsel %vm629_vm2, 0.0, %v3283_v60  ;;  %vm1990_vm2 = vcmask 1046534  }
 0x2ba   : > { %v610_v59 = vpop.permute.xlu1 %609  ;;  %v616_v61 = vpop.permute.xlu0 %615 }
 0x2bb   : > { %vm630_vm3 = vcmp.lt.s32.totalorder %v3538_v57, %v610_v59  ;;  %vm632_vm6 = vcmp.lt.s32.totalorder %v3538_v57, %v616_v61 }
 0x2bc   : > { %v638_v4 = vsel %vm630_vm3, 0.0, %v3283_v60  ;;  %v640_v14 = vsel %vm632_vm6, 0.0, %v3283_v60  ;;  %vm1993_vm3 = vcmask 1047559  }
 0x2be   : > { %v613_v3 = vpop.permute.xlu1 %612  ;;  %v622_v6 = vpop.permute.xlu0 %621 }
 0x2bf   : > { %vm631_vm5 = vcmp.lt.s32.totalorder %v3538_v57, %v613_v3  ;;  %vm634_vm7 = vcmp.lt.s32.totalorder %v3538_v57, %v622_v6 }
 0x2c0   : > { %v639_v9 = vsel %vm631_vm5, 0.0, %v3283_v60  ;;  %v642_v21 = vsel %vm634_vm7, 0.0, %v3283_v60 }
 0x2c2   : > { %v619_v8 = vpop.permute.xlu1 %618  ;;  %v628_v12 = vpop.permute.xlu0 %627 }
 0x2c3   : > { %vm633_vm8 = vcmp.lt.s32.totalorder %v3538_v57, %v619_v8  ;;  %vm636_vm9 = vcmp.lt.s32.totalorder %v3538_v57, %v628_v12 }
 0x2c4   : > { %v641_v26 = vsel %vm633_vm8, 0.0, %v3283_v60  ;;  %v644_v40 = vsel %vm636_vm9, 0.0, %v3283_v60 }
 0x2c6   : > { %v625_v19 = vpop.permute.xlu1 %624 }
 0x2c7   : > { %vm635_vm10 = vcmp.lt.s32.totalorder %v3538_v57, %v625_v19 }
 0x2c8   : > { %v643_v46 = vsel %vm635_vm10, 0.0, %v3283_v60 }
 0x370   : > { %v718_v62 = vpop.f32.mrb[0].mxu1 }
 0x371   : > { %v3542_v63 = vadd.f32 %v718_v62, %v637_v36  ;;  %v2978_v2 = vpop.f32.mrb[1].mxu1 }
 0x373   : > { %v1262_v16 = vsel %vm1261_vm4, %v3542_v63, -inf }
 0x374   : > { %v795_v5 = vpop.f32.mrb[2].mxu1  ;;  %1263 = vmax.xlane.f32.xlu1 %v1262_v16 }
 0x375   : > { %v796_v44 = vadd.f32 %v795_v5, %v638_v4  ;;  %v2983_v37 = vpop.f32.mrb[3].mxu1 }
 0x377   : > { %v1265_v7 = vsel %vm1261_vm4, %v796_v44, -inf }
 0x378   : > { %1266 = vmax.xlane.f32.xlu0 %v1265_v7  ;;  %v872_v45 = vpop.f32.mrb[4].mxu1 }
 0x379   : > { %v873_v10 = vadd.f32 %v872_v45, %v639_v9  ;;  %v2988_v54 = vpop.f32.mrb[5].mxu1 }
 0x37b   : > { %v1268_v11 = vsel %vm1261_vm4, %v873_v10, -inf }
 0x37c   : > { %v1103_v13 = vpop.f32.mrb[8].mxu0  ;;  %1269 = vmax.xlane.f32.xlu0 %v1268_v11  ;;  %v949_v55 = vpop.f32.mrb[6].mxu1 }
 0x37d   : > { %v3552_v1 = vadd.f32 %v949_v55, %v640_v14  ;;  %v2993_v15 = vpop.f32.mrb[7].mxu1  ;;  %v3003_v17 = vpop.f32.mrb[9].mxu0  ;;  %v1104_v23 = vadd.f32 %v1103_v13, %v642_v21 }
 0x37f   : > { %v1271_v25 = vsel %vm1261_vm4, %v3552_v1, -inf  ;;  %v1277_v43 = vsel %vm1261_vm4, %v1104_v23, -inf }
 0x380   : > { %v1026_v29 = vpop.f32.mrb[8].mxu1  ;;  %v1257_v30 = vpop.f32.mrb[10].mxu0  ;;  %1272 = vmax.xlane.f32.xlu0 %v1271_v25 }
 0x381   : > { %v1027_v34 = vadd.f32 %v1026_v29, %v641_v26  ;;  %v2998_v38 = vpop.f32.mrb[9].mxu1  ;;  %v3013_v39 = vpop.f32.mrb[11].mxu0  ;;  %v1258_v41 = vadd.f32 %v1257_v30, %v644_v40 }
 0x383   : > { %v1274_v42 = vsel %vm1261_vm4, %v1027_v34, -inf  ;;  %v1283_v51 = vsel %vm1261_vm4, %v1258_v41, -inf }
 0x384   : > { %v1180_v47 = vpop.f32.mrb[10].mxu1  ;;  %1275 = vmax.xlane.f32.xlu1 %v1274_v42  ;;  %1278 = vmax.xlane.f32.xlu0 %v1277_v43 }
 0x385   : > { %v1181_v48 = vadd.f32 %v1180_v47, %v643_v46  ;;  %v3008_v49 = vpop.f32.mrb[11].mxu1 }
 0x387   : > { %v1280_v50 = vsel %vm1261_vm4, %v1181_v48, -inf }
 0x388   : > { %1281 = vmax.xlane.f32.xlu1 %v1280_v50  ;;  %1284 = vmax.xlane.f32.xlu0 %v1283_v51 }
 0x399   : > { %1350 = vrot.lane.b32.xlu1 %v3461_v20, %s3284_s23 }
 0x39d   : > { %1502 = vrot.lane.b32.xlu1 %v3465_v24, %s3284_s23 }
 0x39e   : > { %1426 = vrot.lane.b32.xlu0 %v3459_v18, %s3284_s23 }
 0x3a1   : > { %1578 = vrot.lane.b32.xlu1 %v3468_v27, %s3284_s23 }
 0x3a5   : > { %1654 = vrot.lane.b32.xlu1 %v3470_v28, %s3284_s23 }
 0x401   : > { %v1264_v52 = vpop.xlane.xlu1 %1263 }
 0x402   : > { %v1286_v53 = vsub.f32 %v3542_v63, %v1264_v52 }
 0x404   : > { %v1294_v56 = vmul.f32 1.442695, %v1286_v53 }
 0x405   : > { %v1267_v58 = vpop.xlane.xlu0 %1266 }
 0x406   : > { %3234 = vpow2.f32 %v1294_v56  ;;  %v1287_v59 = vsub.f32 %v796_v44, %v1267_v58 }
 0x408   : > { %v1296_v20 = vmul.f32 1.442695, %v1287_v59 }
 0x409   : > { %v1270_v60 = vpop.xlane.xlu0 %1269 }
 0x40a   : > { %3236 = vpow2.f32 %v1296_v20  ;;  %v1288_v24 = vsub.f32 %v873_v10, %v1270_v60 }
 0x40c   : > { %v1298_v36 = vmul.f32 1.442695, %v1288_v24 }
 0x40d   : > { %v1273_v61 = vpop.xlane.xlu0 %1272 }
 0x40e   : > { %3238 = vpow2.f32 %v1298_v36  ;;  %v1289_v5 = vsub.f32 %v3552_v1, %v1273_v61 }
 0x410   : > { %v3235_v18 = vpop.eup %3234  ;;  %v1300_v54 = vmul.f32 1.442695, %v1289_v5  ;;  %v1964_v5 = vld [vmem:[%s3926_s5 + $0x30] sm:$0xff] }
 0x411   : > { %v1276_v62 = vpop.xlane.xlu1 %1275  ;;  %v1279_v27 = vpop.xlane.xlu0 %1278  ;;  %v1310_v2 = vsel %vm1261_vm4, %v3235_v18, 0.0 }
 0x412   : > { %v1290_v28 = vsub.f32 %v1027_v34, %v1276_v62  ;;  %v1291_v3 = vsub.f32 %v1104_v23, %v1279_v27  ;;  %1311 = vadd.xlane.f32.xlu1 %v1310_v2  ;;  %v3285_v27 = vmov 0.0|0.0   ;;  %v1962_v2 = vld [vmem:[%s3926_s5 + $0x20] sm:$0xff] }
 0x414   : > { %v3237_v63 = vpop.eup %3236  ;;  %v1302_v4 = vmul.f32 1.442695, %v1290_v28  ;;  %v1304_v16 = vmul.f32 1.442695, %v1291_v3  ;;  %v1963_v28 = vld [vmem:[%s3926_s5 + $0x28] sm:$0xff]  ;;  %v2071_v3 = vld [vmem:[%s3926_s5 + $0x60] sm:$0xff] }
 0x415   : > { %v1282_v44 = vpop.xlane.xlu1 %1281  ;;  %v1285_v37 = vpop.xlane.xlu0 %1284  ;;  %v1313_v6 = vsel %vm1261_vm4, %v3237_v63, 0.0 }
 0x416   : > { %3240 = vpow2.f32 %v1302_v4  ;;  %v1292_v7 = vsub.f32 %v1181_v48, %v1282_v44  ;;  %v1293_v8 = vsub.f32 %v1258_v41, %v1285_v37  ;;  %1314 = vadd.xlane.f32.xlu0 %v1313_v6  ;;  %v2072_v4 = vld [vmem:[%s3926_s5 + $0x68] sm:$0xff]  ;;  %v1965_v44 = vld [vmem:[%s3926_s5 + $0x38] sm:$0xff]  ;;  %v2073_v37 = vld [vmem:[%s3926_s5 + $0x70] sm:$0xff] }
 0x417   : > { %3242 = vpow2.f32 %v1304_v16  ;;  %v3157_v16 = vpack.c.bf16 %v2072_v4, %v2071_v3  ;;  %v3154_v6 = vpack.c.bf16 %v1965_v44, %v1964_v5  ;;  %v3703_v3 = vld [vmem:[%s3926_s5 + $0xb0] sm:$0xff] }
 0x418   : > { %v3239_v9 = vpop.eup %3238  ;;  %v1306_v45 = vmul.f32 1.442695, %v1292_v7  ;;  %v1308_v10 = vmul.f32 1.442695, %v1293_v8  ;;  %v2074_v7 = vld [vmem:[%s3926_s5 + $0x78] sm:$0xff]  ;;  %v3713_v4 = vld [vmem:[%s3926_s5 + $0xf0] sm:$0xff] }
 0x419   : > { %v1351_v11 = vpop.permute.xlu1 %1350  ;;  %v1427_v12 = vpop.permute.xlu0 %1426  ;;  %v1316_v13 = vsel %vm1261_vm4, %v3239_v9, 0.0  ;;  %v3160_v8 = vpack.c.bf16 %v2074_v7, %v2073_v37 }
 0x41a   : > { %3244 = vpow2.f32 %v1306_v45  ;;  %3015 = vmatpush3.msra.mxu1 %v1351_v11  ;;  %1317 = vadd.xlane.f32.xlu1 %v1316_v13 }
 0x41b   : > { %3246 = vpow2.f32 %v1308_v10  ;;  %3020 = vmatpush3.msra.mxu0 %v1427_v12  ;;  %3024 = vmatprep.subr.mxu1 %v3279_v0 }
 0x41c   : > { %3029 = vmatprep.subr.mxu0 %v3279_v0  ;;  %3248 = vpow2.f32 %v1300_v54 }
 0x41d   : > { %v1503_v29 = vpop.permute.xlu1 %1502 }
 0x420   : > { %v3241_v14 = vpop.eup %3240 }
 0x421   : > { %v3579_v55 = vpop.eup %3242  ;;  %v1322_v1 = vsel %vm1261_vm4, %v3241_v14, 0.0  ;;  %v1579_v30 = vpop.permute.xlu1 %1578 }
 0x422   : > { %1323 = vadd.xlane.f32.xlu1 %v1322_v1  ;;  %v1325_v15 = vsel %vm1261_vm4, %v3579_v55, 0.0 }
 0x423   : > { %1326 = vadd.xlane.f32.xlu0 %v1325_v15 }
 0x424   : > { %v3245_v17 = vpop.eup %3244 }
 0x425   : > { %v3584_v19 = vpop.eup %3246  ;;  %v1328_v21 = vsel %vm1261_vm4, %v3245_v17, 0.0  ;;  %v1655_v34 = vpop.permute.xlu1 %1654 }
 0x426   : > { %1329 = vadd.xlane.f32.xlu1 %v1328_v21  ;;  %v1331_v23 = vsel %vm1261_vm4, %v3584_v19, 0.0  ;;  %v3249_v25 = vpop.eup %3248 }
 0x427   : > { %1332 = vadd.xlane.f32.xlu0 %v1331_v23  ;;  %v1319_v26 = vsel %vm1261_vm4, %v3249_v25, 0.0 }
 0x42b   : > { %1320 = vadd.xlane.f32.xlu0 %v1319_v26 }
 0x437   : > { %1806 = vrot.lane.b32.xlu1 %v3476_v32, %s3284_s23 }
 0x441   : > { %1730 = vrot.lane.b32.xlu0 %v3474_v31, %s3284_s23 }
 0x445   : > { %1882 = vrot.lane.b32.xlu0 %v3486_v35, %s3284_s23 }
 0x49f   : > { %v1312_v38 = vpop.xlane.xlu1 %1311 }
 0x4a0   : > { %3250 = vrcp.f32 %v1312_v38 }
 0x4a3   : > { %v1315_v39 = vpop.xlane.xlu0 %1314 }
 0x4a4   : > { %3252 = vrcp.f32 %v1315_v39 }
 0x4a7   : > { %v1318_v40 = vpop.xlane.xlu1 %1317 }
 0x4a8   : > { %3254 = vrcp.f32 %v1318_v40 }
 0x4aa   : > { %v3251_v41 = vpop.eup %3250 }
 0x4ab   : > { %v1342_v42 = vmul.f32 %v3251_v41, %v3235_v18 }
 0x4ad   : > { %3017 = vmatmul.mubr.msk.f32.vlgmr.msra.gmra.mrb[12].mxu1 %vm1261_vm4, %v1342_v42 }
 0x4ae   : > { %v3253_v32 = vpop.eup %3252  ;;  %3025 = vmatpush3.msra.mxu1 %v1503_v29  ;;  %3026 = vmatprep.mubr.msk.f32.mxu1 %vm3280_vm1, %v3279_v0 }
 0x4af   : > { %v1343_v31 = vmul.f32 %v3253_v32, %v3237_v63  ;;  %v1324_v35 = vpop.xlane.xlu1 %1323  ;;  %3034 = vmatprep.subr.mxu1 %v3279_v0  ;;  %v3151_v63 = vpack.c.bf16 %v1963_v28, %v1962_v2  ;;  %v3693_v2 = vld [vmem:[%s3926_s5 + $0xe0] sm:$0xff]  ;;  %v3698_v28 = vld [vmem:[%s3926_s5 + $0xe8] sm:$0xff] }
 0x4b0   : > { %3256 = vrcp.f32 %v1324_v35  ;;  %v1327_v43 = vpop.xlane.xlu0 %1326 }
 0x4b1   : > { %3022 = vmatmul.mubr.msk.f32.vlgmr.msra.gmra.mrb[12].mxu0 %vm1261_vm4, %v1343_v31 }
 0x4b2   : > { %v3255_v46 = vpop.eup %3254  ;;  %3030 = vmatpush3.msra.mxu0 %v1579_v30  ;;  %3031 = vmatprep.mubr.msk.f32.mxu0 %vm3280_vm1, %v3279_v0 }
 0x4b3   : > { %v1344_v47 = vmul.f32 %v3255_v46, %v3239_v9  ;;  %v1330_v48 = vpop.xlane.xlu1 %1329  ;;  %3039 = vmatprep.subr.mxu0 %v3279_v0 }
 0x4b4   : > { %3258 = vrcp.f32 %v1330_v48  ;;  %v1333_v49 = vpop.xlane.xlu0 %1332 }
 0x4b5   : > { %3027 = vmatmul.mubr.msk.f32.vlgmr.msra.gmra.mrb[14].mxu1 %vm1261_vm4, %v1344_v47 }
 0x4b6   : > { %3035 = vmatpush3.msra.mxu1 %v1655_v34  ;;  %3036 = vmatprep.mubr.msk.f32.mxu1 %vm3280_vm1, %v3279_v0 }
 0x4b7   : > { %3044 = vmatprep.subr.mxu1 %v3279_v0  ;;  %v1807_v53 = vpop.permute.xlu1 %1806 }
 0x4b8   : > { %v1321_v50 = vpop.xlane.xlu0 %1320 }
 0x4b9   : > { %3260 = vrcp.f32 %v1321_v50 }
 0x4ba   : > { %v3257_v51 = vpop.eup %3256  ;;  %3262 = vrcp.f32 %v1327_v43 }
 0x4bb   : > { %v1346_v52 = vmul.f32 %v3257_v51, %v3241_v14  ;;  %3264 = vrcp.f32 %v1333_v49 }
 0x4bc   : > { %v1731_v60 = vpop.permute.xlu0 %1730 }
 0x4bd   : > { %3037 = vmatmul.mubr.msk.f32.vlgmr.msra.gmra.mrb[16].mxu1 %vm1261_vm4, %v1346_v52 }
 0x4be   : > { %v3259_v56 = vpop.eup %3258  ;;  %3045 = vmatpush3.msra.mxu1 %v1807_v53  ;;  %3046 = vmatprep.mubr.msk.f32.mxu1 %vm3280_vm1, %v3279_v0 }
 0x4bf   : > { %v1348_v58 = vmul.f32 %v3259_v56, %v3245_v17  ;;  %3150 = vmatprep.subr.bf16.mxu1 %v3285_v27 }
 0x4c0   : > { %v1883_v18 = vpop.permute.xlu0 %1882 }
 0x4c1   : > { %3047 = vmatmul.mubr.msk.f32.vlgmr.msra.gmra.mrb[18].mxu1 %vm1261_vm4, %v1348_v58 }
 0x4c2   : > { %3062 = vmatprep.mubr.msk.f32.mxu1 %vm3280_vm1, %v3279_v0  ;;  %3152 = vmatpush3.bf16.msra.mxu1 %v3151_v63  ;;  %v3708_v63 = vld [vmem:[%s3926_s5 + $0xb8] sm:$0xff] }
 0x4c3   : > { %v3261_v59 = vpop.eup %3260  ;;  %3153 = vmatprep.subr.bf16.mxu1 %v3285_v27 }
 0x4c4   : > { %v1345_v20 = vmul.f32 %v3261_v59, %v3249_v25  ;;  %v3263_v24 = vpop.eup %3262 }
 0x4c5   : > { %v1347_v36 = vmul.f32 %v3263_v24, %v3579_v55  ;;  %v3265_v61 = vpop.eup %3264 }
 0x4c6   : > { %3032 = vmatmul.mubr.msk.f32.vlgmr.msra.gmra.mrb[14].mxu0 %vm1261_vm4, %v1345_v20  ;;  %v1349_v62 = vmul.f32 %v3265_v61, %v3584_v19  ;;  %3155 = vmatpush3.bf16.msra.mxu1 %v3154_v6  ;;  %v3169_v6 = vpack.c.bf16 %v3698_v28, %v3693_v2  ;;  %v2068_v2 = vld [vmem:[%s3926_s5 + $0x48] sm:$0xff] }
 0x4c7   : > { %3040 = vmatpush3.msra.mxu0 %v1731_v60  ;;  %3041 = vmatprep.mubr.msk.f32.mxu0 %vm3280_vm1, %v3279_v0 }
 0x4c8   : > { %3049 = vmatprep.subr.mxu0 %v3279_v0  ;;  %3162 = vmatprep.subr.bf16.mxu1 %v3285_v27 }
 0x4ca   : > { %3042 = vmatmul.mubr.msk.f32.vlgmr.msra.gmra.mrb[16].mxu0 %vm1261_vm4, %v1347_v36 }
 0x4cb   : > { %3050 = vmatpush3.msra.mxu0 %v1883_v18  ;;  %3051 = vmatprep.mubr.msk.f32.mxu0 %vm3280_vm1, %v3279_v0  ;;  %v3683_v18 = vld [vmem:[%s3926_s5 + $0xa0] sm:$0xff] }
 0x4cc   : > { %3156 = vmatprep.subr.bf16.mxu0 %v3285_v27 }
 0x4ce   : > { %3052 = vmatmul.mubr.msk.f32.vlgmr.msra.gmra.mrb[18].mxu0 %vm1261_vm4, %v1349_v62  ;;  %v3688_v62 = vld [vmem:[%s3926_s5 + $0xa8] sm:$0xff]  ;;  %vm2725_vm4 = vcmp.eq.s32.totalorder %v3538_v57, 0 }
 0x4cf   : > { %3073 = vmatprep.mubr.msk.f32.mxu0 %vm3280_vm1, %v3279_v0  ;;  %3158 = vmatpush3.bf16.msra.mxu0 %v3157_v16  ;;  %v3718_v16 = vld [vmem:[%s3926_s5 + $0xf8] sm:$0xff]  ;;  %v3163_v37 = vpack.c.bf16 %v3688_v62, %v3683_v18  ;;  %v1959_v18 = vld [vmem:[%s3926_s5 + $0x8] sm:$0xff]  ;;  %v2067_v62 = vld [vmem:[%s3926_s5 + $0x40] sm:$0xff] }
 0x4d0   : > { %3159 = vmatprep.subr.bf16.mxu0 %v3285_v27 }
 0x4d3   : > { %3161 = vmatpush3.bf16.msra.mxu0 %v3160_v8 }
 0x4d4   : > { %3168 = vmatprep.subr.bf16.mxu0 %v3285_v27 }
 0x580   : > { %v1422_v9 = vpop.f32.mrb[12].mxu1 }
 0x581   : > { %v3018_v45 = vpop.f32.mrb[13].mxu1  ;;  %v1974_v10 = vrot.slane %v1422_v9, 1  ;;  %v2075_v54 = vrot.slane %v1422_v9, 3  ;;  %v2169_v11 = vrot.slane %v1422_v9, 5  ;;  %v2263_v12 = vrot.slane %v1422_v9, 7 }
 0x582   : > { %v2435_v13 = vrot.slane %v1422_v9, 2  ;;  %v2521_v14 = vrot.slane %v1422_v9, 4  ;;  %v2607_v55 = vrot.slane %v1422_v9, 6  ;;  %v3172_v45 = vpack.c.bf16 %v3718_v16, %v3713_v4  ;;  %v2070_v4 = vld [vmem:[%s3926_s5 + $0x58] sm:$0xff] }
 0x584   : > { %v1498_v1 = vpop.f32.mrb[12].mxu0 }
 0x585   : > { %v2076_v15 = vrot.slane %v1498_v1, 2  ;;  %v2170_v17 = vrot.slane %v1498_v1, 4  ;;  %v2264_v19 = vrot.slane %v1498_v1, 6  ;;  %v2349_v21 = vrot.slane %v1498_v1, 7  ;;  %v3023_v23 = vpop.f32.mrb[13].mxu0 }
 0x586   : > { %v2436_v25 = vrot.slane %v1498_v1, 1  ;;  %v2522_v26 = vrot.slane %v1498_v1, 3  ;;  %v2608_v29 = vrot.slane %v1498_v1, 5  ;;  %v1976_v30 = vsel %vm1975_vm11, %v1498_v1, %v1974_v10 }
 0x587   : > { %v2077_v34 = vsel %vm1975_vm11, %v2076_v15, %v2075_v54  ;;  %v2171_v38 = vsel %vm1975_vm11, %v2170_v17, %v2169_v11  ;;  %v2265_v39 = vsel %vm1975_vm11, %v2264_v19, %v2263_v12  ;;  %v2350_v40 = vsel %vm1975_vm11, %v2349_v21, %v1422_v9 }
 0x588   : > { %v1574_v41 = vpop.f32.mrb[14].mxu1  ;;  %v2437_v42 = vsel %vm1975_vm11, %v2436_v25, %v2435_v13  ;;  %v2523_v32 = vsel %vm1975_vm11, %v2522_v26, %v2521_v14  ;;  %v2609_v31 = vsel %vm1975_vm11, %v2608_v29, %v2607_v55  ;;  %v3166_v9 = vpack.c.bf16 %v3708_v63, %v3703_v3  ;;  %v1961_v3 = vld [vmem:[%s3926_s5 + $0x18] sm:$0xff]  ;;  %v2069_v63 = vld [vmem:[%s3926_s5 + $0x50] sm:$0xff] }
 0x589   : > { %v1977_v35 = vrot.slane %v1574_v41, 7  ;;  %v2078_v43 = vrot.slane %v1574_v41, 1  ;;  %v2172_v46 = vrot.slane %v1574_v41, 3  ;;  %v2266_v47 = vrot.slane %v1574_v41, 5  ;;  %v3028_v48 = vpop.f32.mrb[15].mxu1 }
 0x58a   : > { %v2351_v49 = vrot.slane %v1574_v41, 6  ;;  %v2524_v50 = vrot.slane %v1574_v41, 2  ;;  %v2610_v51 = vrot.slane %v1574_v41, 4  ;;  %v3665_v52 = vsel %vm1978_vm12, %v1574_v41, %v2437_v42 }
 0x58b   : > { %v1979_v53 = vsel %vm1978_vm12, %v1977_v35, %v1976_v30  ;;  %v2079_v56 = vsel %vm1978_vm12, %v2078_v43, %v2077_v34  ;;  %v2173_v58 = vsel %vm1978_vm12, %v2172_v46, %v2171_v38  ;;  %v2267_v59 = vsel %vm1978_vm12, %v2266_v47, %v2265_v39 }
 0x58c   : > { %v2352_v20 = vsel %vm1978_vm12, %v2351_v49, %v2350_v40  ;;  %v3673_v60 = vsel %vm1978_vm12, %v2524_v50, %v2523_v32  ;;  %v3676_v24 = vsel %vm1978_vm12, %v2610_v51, %v2609_v31 }
 0x590   : > { %v3678_v36 = vpop.f32.mrb[16].mxu1 }
 0x591   : > { %v3038_v61 = vpop.f32.mrb[17].mxu1  ;;  %v1983_v7 = vrot.slane %v3678_v36, 5  ;;  %v2081_v8 = vrot.slane %v3678_v36, 7  ;;  %v2176_v10 = vrot.slane %v3678_v36, 1  ;;  %v2270_v54 = vrot.slane %v3678_v36, 3 }
 0x592   : > { %v2355_v11 = vrot.slane %v3678_v36, 4  ;;  %v2441_v12 = vrot.slane %v3678_v36, 6  ;;  %v2614_v1 = vrot.slane %v3678_v36, 2 }
 0x594   : > { %v3720_v5 = vpop.f32.mrb[18].mxu1 }
 0x595   : > { %v3048_v44 = vpop.f32.mrb[19].mxu1  ;;  %v1989_v13 = vrot.slane %v3720_v5, 3  ;;  %v2085_v14 = vrot.slane %v3720_v5, 5  ;;  %v2179_v55 = vrot.slane %v3720_v5, 7  ;;  %v2274_v17 = vrot.slane %v3720_v5, 1 }
 0x596   : > { %v2359_v19 = vrot.slane %v3720_v5, 2  ;;  %v2445_v21 = vrot.slane %v3720_v5, 4  ;;  %v2531_v23 = vrot.slane %v3720_v5, 6 }
 0x599   : > { %v3740_v15 = vpop.f32.mrb[14].mxu0 }
 0x59a   : > { %v3033_v25 = vpop.f32.mrb[15].mxu0  ;;  %v1980_v26 = vrot.slane %v3740_v15, 6  ;;  %v2080_v29 = vsel %vm1981_vm13, %v3740_v15, %v2079_v56  ;;  %v2174_v30 = vrot.slane %v3740_v15, 2  ;;  %v2268_v34 = vrot.slane %v3740_v15, 4 }
 0x59b   : > { %v2082_v38 = vsel %vm1984_vm14, %v2081_v8, %v2080_v29  ;;  %v2353_v39 = vrot.slane %v3740_v15, 5  ;;  %v2439_v40 = vrot.slane %v3740_v15, 7  ;;  %v2526_v41 = vrot.slane %v3740_v15, 1 }
 0x59c   : > { %v1982_v42 = vsel %vm1981_vm13, %v1980_v26, %v1979_v53  ;;  %v2175_v32 = vsel %vm1981_vm13, %v2174_v30, %v2173_v58  ;;  %v2269_v31 = vsel %vm1981_vm13, %v2268_v34, %v2267_v59  ;;  %v2612_v35 = vrot.slane %v3740_v15, 3 }
 0x59d   : > { %v3759_v43 = vpop.f32.mrb[16].mxu0  ;;  %v1985_v46 = vsel %vm1984_vm14, %v1983_v7, %v1982_v42  ;;  %v2177_v47 = vsel %vm1984_vm14, %v2176_v10, %v2175_v32  ;;  %v2271_v48 = vsel %vm1984_vm14, %v2270_v54, %v2269_v31  ;;  %v2354_v49 = vsel %vm1981_vm13, %v2353_v39, %v2352_v20 }
 0x59e   : > { %v3043_v50 = vpop.f32.mrb[17].mxu0  ;;  %v1986_v51 = vrot.slane %v3759_v43, 4  ;;  %v2083_v53 = vrot.slane %v3759_v43, 6  ;;  %v2178_v56 = vsel %vm1987_vm15, %v3759_v43, %v2177_v47  ;;  %v2272_v58 = vrot.slane %v3759_v43, 2 }
 0x59f   : > { %v2180_v59 = vsel %vm1990_vm2, %v2179_v55, %v2178_v56  ;;  %v2356_v61 = vsel %vm1984_vm14, %v2355_v11, %v2354_v49  ;;  %v2357_v44 = vrot.slane %v3759_v43, 3  ;;  %v2440_v7 = vsel %vm1981_vm13, %v2439_v40, %v3665_v52  ;;  %v2255_v56 = vld [vmem:[%s3926_s5 + $0xc0] sm:$0xff] }
 0x5a0   : > { %v1988_v20 = vsel %vm1987_vm15, %v1986_v51, %v1985_v46  ;;  %v2084_v8 = vsel %vm1987_vm15, %v2083_v53, %v2082_v38  ;;  %v2273_v10 = vsel %vm1987_vm15, %v2272_v58, %v2271_v48  ;;  %v2442_v54 = vsel %vm1984_vm14, %v2441_v12, %v2440_v7  ;;  %v2256_v58 = vld [vmem:[%s3926_s5 + $0xc8] sm:$0xff]  ;;  %v2164_v7 = vld [vmem:[%s3926_s5 + $0x98] sm:$0xff] }
 0x5a1   : > { %v1954_v15 = vpop.f32.mrb[18].mxu0  ;;  %v1991_v25 = vsel %vm1990_vm2, %v1989_v13, %v1988_v20  ;;  %v2086_v55 = vsel %vm1990_vm2, %v2085_v14, %v2084_v8  ;;  %v2275_v11 = vsel %vm1990_vm2, %v2274_v17, %v2273_v10  ;;  %v2358_v26 = vsel %vm1987_vm15, %v2357_v44, %v2356_v61  ;;  %v2163_v44 = vld [vmem:[%s3926_s5 + $0x90] sm:$0xff]  ;;  %v2258_v8 = vld [vmem:[%s3926_s5 + $0xd8] sm:$0xff] }
 0x5a2   : > { %v3053_v29 = vpop.f32.mrb[19].mxu0  ;;  %v1992_v30 = vrot.slane %v1954_v15, 2  ;;  %v2087_v52 = vrot.slane %v1954_v15, 4  ;;  %v2181_v34 = vrot.slane %v1954_v15, 6  ;;  %v2276_v39 = vsel %vm1993_vm3, %v1954_v15, %v2275_v11  ;;  %v2257_v20 = vld [vmem:[%s3926_s5 + $0xd0] sm:$0xff] }
 0x5a3   : > { %v2360_v38 = vsel %vm1990_vm2, %v2359_v19, %v2358_v26  ;;  %v2361_v40 = vrot.slane %v1954_v15, 1  ;;  %v2443_v12 = vrot.slane %v3759_v43, 5  ;;  %v2447_v42 = vrot.slane %v1954_v15, 3 }
 0x5a4   : > { %v1994_v13 = vsel %vm1993_vm3, %v1992_v30, %v1991_v25  ;;  %v2088_v14 = vsel %vm1993_vm3, %v2087_v52, %v2086_v55  ;;  %v2182_v17 = vsel %vm1993_vm3, %v2181_v34, %v2180_v59  ;;  %v2527_v32 = vsel %vm1981_vm13, %v2526_v41, %v3673_v60  ;;  %v1958_v60 = vld [vmem:[%s3926_s5] sm:$0xff] }
 0x5a5   : > { %3063 = vmatmul.mubr.msk.f32.vlgmr.msra.gmra.mrb[20].mxu1 %vm296_vm0, %v1994_v13  ;;  %3074 = vmatmul.mubr.msk.f32.vlgmr.msra.gmra.mrb[20].mxu0 %vm296_vm0, %v2088_v14  ;;  %v2362_v31 = vsel %vm1993_vm3, %v2361_v40, %v2360_v38  ;;  %v2444_v19 = vsel %vm1987_vm15, %v2443_v12, %v2442_v54  ;;  %v2528_v46 = vsel %vm1984_vm14, %v3678_v36, %v2527_v32  ;;  %v2529_v47 = vrot.slane %v3759_v43, 7 }
 0x5a6   : > { %3164 = vmatpush3.bf16.msra.mxu1 %v3163_v37  ;;  %3170 = vmatpush3.bf16.msra.mxu0 %v3169_v6  ;;  %v2446_v41 = vsel %vm1990_vm2, %v2445_v21, %v2444_v19  ;;  %v2533_v48 = vrot.slane %v1954_v15, 5  ;;  %v2613_v49 = vsel %vm1981_vm13, %v2612_v35, %v3676_v24  ;;  %v2616_v50 = vrot.slane %v3759_v43, 1 }
 0x5a7   : > { %3165 = vmatprep.subr.bf16.mxu1 %v3285_v27  ;;  %3171 = vmatprep.subr.bf16.mxu0 %v3285_v27  ;;  %v2448_v24 = vsel %vm1993_vm3, %v2447_v42, %v2446_v41  ;;  %v2530_v28 = vsel %vm1987_vm15, %v2529_v47, %v2528_v46  ;;  %v2615_v37 = vsel %vm1984_vm14, %v2614_v1, %v2613_v49  ;;  %v2619_v6 = vrot.slane %v1954_v15, 7  ;;  %v3270_v47 = vld [vmem:[%s3924_s3] sm:$0xff] }
 0x5a8   : > { %3084 = vmatprep.mubr.msk.f32.mxu1 %vm3280_vm1, %v3279_v0  ;;  %3095 = vmatprep.mubr.msk.f32.mxu0 %vm3280_vm1, %v3279_v0  ;;  %v2532_v21 = vsel %vm1990_vm2, %v2531_v23, %v2530_v28  ;;  %v2617_v35 = vsel %vm1987_vm15, %v2616_v50, %v2615_v37  ;;  %v3175_v1 = vpack.c.bf16 %v1959_v18, %v1958_v60  ;;  %v1960_v23 = vld [vmem:[%s3926_s5 + $0x10] sm:$0xff]  ;;  %v2698_v42 = vsub.s32 3, %v3424_v22 }
 0x5a9   : > { %v2534_v43 = vsel %vm1993_vm3, %v2533_v48, %v2532_v21  ;;  %v2618_v36 = vsel %vm1990_vm2, %v3720_v5, %v2617_v35  ;;  %v3181_v51 = vpack.c.bf16 %v2068_v2, %v2067_v62  ;;  %v3178_v16 = vpack.c.bf16 %v1961_v3, %v1960_v23 }
 0x5aa   : > { %3167 = vmatpush3.bf16.msra.mxu1 %v3166_v9  ;;  %3173 = vmatpush3.bf16.msra.mxu0 %v3172_v45  ;;  %v2620_v53 = vsel %vm1993_vm3, %v2619_v6, %v2618_v36  ;;  %v3184_v5 = vpack.c.bf16 %v2070_v4, %v2069_v63  ;;  %v2161_v9 = vld [vmem:[%s3926_s5 + $0x80] sm:$0xff]  ;;  %v2162_v45 = vld [vmem:[%s3926_s5 + $0x88] sm:$0xff]  ;;  %v3193_v61 = vpack.c.bf16 %v2256_v58, %v2255_v56  ;;  %v2718_v41 = vsub.s32 6, %v3424_v22 }
 0x5ab   : > { %3174 = vmatprep.subr.bf16.mxu1 %v3285_v27  ;;  %3180 = vmatprep.subr.bf16.mxu0 %v3285_v27  ;;  %v3187_v59 = vpack.c.bf16 %v2162_v45, %v2161_v9  ;;  %v3190_v10 = vpack.c.bf16 %v2164_v7, %v2163_v44  ;;  %v3196_v54 = vpack.c.bf16 %v2258_v8, %v2257_v20  ;;  %v2704_v48 = vsub.s32 5, %v3424_v22 }
 0x5ac   : > { %v2699_v60 = vrot.slane %v3270_v47, %v2698_v42  ;;  %v2719_v18 = vrot.slane %v3270_v47, %v2718_v41  ;;  %v3286_v21 = vmov 1   ;;  %v2713_v35 = vsub.s32 4, %v3424_v22 }
 0x5ad   : > { %3085 = vmatmul.mubr.msk.f32.vlgmr.msra.gmra.mrb[22].mxu1 %vm296_vm0, %v2182_v17  ;;  %3096 = vmatmul.mubr.msk.f32.vlgmr.msra.gmra.mrb[22].mxu0 %vm296_vm0, %v2276_v39  ;;  %v2705_v62 = vrot.slane %v3270_v47, %v2704_v48 }
 0x5ae   : > { %3176 = vmatpush3.bf16.msra.mxu1 %v3175_v1  ;;  %3182 = vmatpush3.bf16.msra.mxu0 %v3181_v51 }
 0x5af   : > { %3177 = vmatprep.subr.bf16.mxu1 %v3285_v27  ;;  %3183 = vmatprep.subr.bf16.mxu0 %v3285_v27 }
 0x5b0   : > { %3106 = vmatprep.mubr.msk.f32.mxu1 %vm3280_vm1, %v3279_v0  ;;  %3117 = vmatprep.mubr.msk.f32.mxu0 %vm3280_vm1, %v3279_v0 }
 0x5b1   : > { %3216 = vset.pattern.permute.xlu0 %v3286_v21 }
 0x5b2   : > { %3179 = vmatpush3.bf16.msra.mxu1 %v3178_v16  ;;  %3185 = vmatpush3.bf16.msra.mxu0 %v3184_v5 }
 0x5b3   : > { %3186 = vmatprep.subr.bf16.mxu1 %v3285_v27  ;;  %3192 = vmatprep.subr.bf16.mxu0 %v3285_v27 }
 0x5b5   : > { %3107 = vmatmul.mubr.msk.f32.vlgmr.msra.gmra.mrb[24].mxu1 %vm296_vm0, %v2362_v31  ;;  %3118 = vmatmul.mubr.msk.f32.vlgmr.msra.gmra.mrb[24].mxu0 %vm296_vm0, %v2448_v24 }
 0x5b6   : > { %3188 = vmatpush3.bf16.msra.mxu1 %v3187_v59  ;;  %3194 = vmatpush3.bf16.msra.mxu0 %v3193_v61 }
 0x5b7   : > { %3189 = vmatprep.subr.bf16.mxu1 %v3285_v27  ;;  %3195 = vmatprep.subr.bf16.mxu0 %v3285_v27 }
 0x5b8   : > { %3128 = vmatprep.mubr.msk.f32.mxu1 %vm3280_vm1, %v3279_v0  ;;  %3139 = vmatprep.mubr.msk.f32.mxu0 %vm3280_vm1, %v3279_v0  ;;  %vm2726_vm1 = vcmp.eq.s32.totalorder %v3538_v57, 1 }
 0x5ba   : > { %3191 = vmatpush3.bf16.msra.mxu1 %v3190_v10  ;;  %3197 = vmatpush3.bf16.msra.mxu0 %v3196_v54 }
 0x5bd   : > { %3129 = vmatmul.mubr.msk.f32.vlgmr.msra.gmra.mrb[26].mxu1 %vm296_vm0, %v2534_v43  ;;  %3140 = vmatmul.mubr.msk.f32.vlgmr.msra.gmra.mrb[26].mxu0 %vm296_vm0, %v2620_v53  ;;  %vm2707_vm0 = vcmask 408576   ;;  %v2714_v43 = vrot.slane %v3270_v47, %v2713_v35 }
 0x678   : > { %v2063_v15 = vpop.f32.mrb[20].mxu1  ;;  %v2157_v25 = vpop.f32.mrb[20].mxu0 }
 0x679   : > { %v3064_v55 = vpop.f32.mrb[21].mxu1  ;;  %v3075_v11 = vpop.f32.mrb[21].mxu0 }
 0x680   : > { %v2251_v26 = vpop.f32.mrb[22].mxu1  ;;  %v2345_v29 = vpop.f32.mrb[22].mxu0 }
 0x681   : > { %v3086_v30 = vpop.f32.mrb[23].mxu1  ;;  %v3097_v27 = vpop.f32.mrb[23].mxu0 }
 0x688   : > { %v2431_v52 = vpop.f32.mrb[24].mxu1  ;;  %v2517_v34 = vpop.f32.mrb[24].mxu0 }
 0x689   : > { %v2432_v39 = vadd.f32 %v2431_v52, %v2063_v15  ;;  %v2518_v38 = vadd.f32 %v2517_v34, %v2157_v25  ;;  %v3108_v40 = vpop.f32.mrb[25].mxu1  ;;  %v3119_v0 = vpop.f32.mrb[25].mxu0 }
 0x68b   : > { %v2693_v12 = vadd.f32 %v2518_v38, %v2432_v39 }
 0x690   : > { %v2603_v13 = vpop.f32.mrb[26].mxu1  ;;  %v2689_v14 = vpop.f32.mrb[26].mxu0 }
 0x691   : > { %v2604_v17 = vadd.f32 %v2603_v13, %v2251_v26  ;;  %v2690_v32 = vadd.f32 %v2689_v14, %v2345_v29  ;;  %v3130_v31 = vpop.f32.mrb[27].mxu1  ;;  %v3141_v19 = vpop.f32.mrb[27].mxu0 }
 0x693   : > { %v2694_v46 = vadd.f32 %v2690_v32, %v2604_v17 }
 0x695   : > { %v2695_v49 = vadd.f32 %v2694_v46, %v2693_v12 }
 0x697   : > { %v2700_v50 = vadd.f32 %v2699_v60, %v2695_v49 }
 0x699   : > { %v2701_v2 = vmax.f32 %v2700_v50, 0.0 }
 0x69b   : > { %v2720_v24 = vmul.f32 %v2719_v18, %v2701_v2  ;;  %v2706_v28 = vmul.f32 %v2705_v62, %v2701_v2 }
 0x69d   : > { %v2721_v37 = vsel %vm2707_vm0, %v2720_v24, 0.0  ;;  %v2708_v6 = vsel %vm2707_vm0, %v2706_v28, 0.0 }
 0x69e   : > { %2722 = vadd.xlane.f32.xlu1 %v2721_v37  ;;  %2709 = vadd.xlane.f32.xlu0 %v2708_v6 }
 0x72b   : > { %v2723_v36 = vpop.xlane.xlu1 %2722  ;;  %v2710_v1 = vpop.xlane.xlu0 %2709 }
 0x72c   : > { %v2724_v51 = vadd.f32 %v2723_v36, %v2714_v43  ;;  %v2715_v23 = vadd.f32 %v2714_v43, %v2710_v1 }
 0x72e   : > { %2729 = vperm.xlu0 %3216, %v2724_v51   ;;  %2735 = vperm.xlu1 %3215, %v2715_v23  }
 0x732   : > { %3217 = vset.pattern.permute.xlu0 %v3282_v33 }
 0x7ad   : > { %v2736_v53 = vpop.permute.xlu1 %2735  ;;  %v2730_v3 = vpop.permute.xlu0 %2729 }
 0x7ae   : > { %v2732_v63 = vsel %vm2726_vm1, %v2730_v3, -1e+09 }
 0x7af   : > { %v2738_v4 = vsel %vm2725_vm4, %v2736_v53, %v2732_v63 }
 0x7b0   : > { %2739 = vmax.xlane.f32.xlu1 %v2738_v4 }
 0x83d   : > { %v2740_v22 = vpop.xlane.xlu1 %2739 }
 0x83e   : > { %v2741_v16 = vsub.f32 %v2738_v4, %v2740_v22 }
 0x840   : > { %v2742_v5 = vmul.f32 1.442695, %v2741_v16 }
 0x842   : > { %3266 = vpow2.f32 %v2742_v5 }
 0x84c   : > { %v3267_v9 = vpop.eup %3266 }
 0x84d   : > { %2744 = vadd.xlane.f32.xlu0 %v3267_v9 }
 0x8da   : > { %v2745_v45 = vpop.xlane.xlu0 %2744 }
 0x8db   : > { %3268 = vrcp.f32 %v2745_v45 }
 0x8e5   : > { %v3269_v33 = vpop.eup %3268 }
 0x8e6   : > { %v2747_v57 = vmul.f32 %v3269_v33, %v3267_v9 }
 0x8e8   : > { %2748 = vst [vmem:[%s270_s16] sm:$0xff] %v2747_v57 }
 0x8e9 PF: > { %s16_s21 = sadd.s32 1, %s3277_s21  }
 0x8ea   : > { %p13_p5 = scmp.ge.s32.totalorder %s16_s21, 6  }
 0x8ec   :  { %15 = sbr.rel (!%p13_p5) target bundleno = 1 (0x1), region = 77 }

</bundles_post_ra>
